<compile_context>
chip_gen: v7x
topology: tpu7x:2x2x1
jax: 0.10.0
libtpu: 0.0.40
codegen_flags: <defaults>
</compile_context>

<pallas_src>
import jax
import jax.numpy as jnp
from jax import lax
from jax.experimental import pallas as pl
from jax.experimental.pallas import tpu as pltpu


# ----------------------------- kernel ---------------------------------------


def _fusion_kernel(x0_ref, x1_ref,
                   w10_ref, b10_ref, w11_ref, b11_ref,
                   w20_ref, b20_ref, w21_ref, b21_ref,
                   wc1a_ref, wc1b_ref, bc1_ref, wc2_ref, bc2_ref,
                   o_ref):
    f32, bf16 = jnp.float32, jnp.bfloat16

    # Raw f32 inputs -> bf16 MXU operands (free VPU cast; no wrapper-side HBM pass).
    x0 = x0_ref[...].astype(bf16)
    x1 = x1_ref[...].astype(bf16)

    # Per-modality ModalityEncoder: Linear -> ReLU -> (Dropout = id) -> Linear.
    h0 = jnp.dot(x0, w10_ref[...], preferred_element_type=f32) + b10_ref[...]
    h1 = jnp.dot(x1, w11_ref[...], preferred_element_type=f32) + b11_ref[...]
    h0 = jnp.maximum(h0, 0.0)
    h1 = jnp.maximum(h1, 0.0)
    f0 = jnp.dot(h0.astype(bf16), w20_ref[...], preferred_element_type=f32) + b20_ref[...]
    f1 = jnp.dot(h1.astype(bf16), w21_ref[...], preferred_element_type=f32) + b21_ref[...]

    # Classifier: ReLU -> (Dropout = id) -> Linear -> ReLU -> (Dropout = id) -> Linear.
    # torch.cat([f0, f1], -1) @ wc1  ==  f0 @ wc1[:E] + f1 @ wc1[E:]  (exact), so no concat.
    r0 = jnp.maximum(f0, 0.0).astype(bf16)
    r1 = jnp.maximum(f1, 0.0).astype(bf16)
    c = (jnp.dot(r0, wc1a_ref[...], preferred_element_type=f32)
         + jnp.dot(r1, wc1b_ref[...], preferred_element_type=f32)
         + bc1_ref[...])
    c = jnp.maximum(c, 0.0).astype(bf16)        # cast BEFORE any layout change

    # Final (hidden -> 1) computed as a lane-dense (1, B_TILE) row:
    #   out(1, Bt) = wc2(1, H) . c(Bt, H), contracting the last dim of each
    # (Mosaic picks the contraction layout; no materialized f32 transpose).
    out = lax.dot_general(wc2_ref[...], c,
                          dimension_numbers=(((1,), (1,)), ((), ())),
                          preferred_element_type=f32)
    o_ref[...] = (out + bc2_ref[...]).astype(o_ref.dtype)


# ----------------------------- wrapper ---------------------------------------


def intermediate_integration_forward(inputs, packed, *, b_tile=1024):
    """inputs: [(B, d0) f32, (B, d1) f32]. packed: params from pack_params()."""
    x0, x1 = inputs
    B = x0.shape[0]
    d0, d1 = x0.shape[1], x1.shape[1]

    # Collapse the grid to one step when the whole batch fits in a single tile;
    # otherwise tile the batch (b_tile must be lane-aligned for the output row).
    if B <= b_tile:
        bt, num_tiles = B, 1
    else:
        assert b_tile % 128 == 0, "multi-tile b_tile must be a multiple of 128"
        bt, num_tiles = b_tile, pl.cdiv(B, b_tile)
        # A ragged last block is handled by Pallas: the padded rows hold garbage, but
        # every op here is row-wise and out-of-range output columns are never written.

    w10, b10 = packed["w1_0"], packed["b1_0"]
    w11, b11 = packed["w1_1"], packed["b1_1"]
    w20, b20 = packed["w2_0"], packed["b2_0"]
    w21, b21 = packed["w2_1"], packed["b2_1"]
    wc1a, wc1b, bc1 = packed["wc1a"], packed["wc1b"], packed["bc1"]
    wc2, bc2 = packed["wc2"], packed["bc2"]

    H = w10.shape[1]      # hidden_dim
    E = w20.shape[1]      # encoded_dim

    weights = [w10, b10, w11, b11, w20, b20, w21, b21, wc1a, wc1b, bc1, wc2, bc2]

    flops = 2 * B * ((d0 + d1) * H + 2 * H * E + 2 * E * H + H)
    bytes_accessed = (
        (x0.size + x1.size + B) * 4                                  # f32 inputs + f32 output
        + sum(int(w.size) * int(w.dtype.itemsize) for w in weights)  # bf16 weights, f32 biases
    )

    # Constant index_map -> weights/biases stay VMEM-resident across grid steps.
    const = lambda i: (0, 0)
    # NOTE: pipeline_mode=pl.Buffered(1) on these constant specs would save ~120 KiB of
    # double-buffer VMEM; skipped (negligible win, compile risk). See header comment.

    out = pl.pallas_call(
        _fusion_kernel,
        out_shape=jax.ShapeDtypeStruct((1, B), jnp.float32),
        grid=(num_tiles,),
        in_specs=[
            pl.BlockSpec((bt, d0), lambda i: (i, 0)),   # batch-tiled f32 inputs
            pl.BlockSpec((bt, d1), lambda i: (i, 0)),
        ] + [pl.BlockSpec(w.shape, const) for w in weights],
        out_specs=pl.BlockSpec((1, bt), lambda i: (0, i)),  # lane-dense output row
        compiler_params=pltpu.CompilerParams(
            # TODO(synk): pltpu.CORE_PARALLEL / pl.core_map for true 2-TC sharding on v7x.
            dimension_semantics=("parallel",),
            vmem_limit_bytes=32 * 1024 * 1024,
        ),
        cost_estimate=pl.CostEstimate(
            flops=flops, transcendentals=0, bytes_accessed=bytes_accessed),
    )(x0, x1, *weights)

    # PyTorch: .squeeze(-1)
    return out[0]


# ----------------------------- params ----------------------------------------


def init_raw_params(key, input_dims, hidden_dim, encoded_dim):
    """PyTorch-Linear-style (fan-in uniform) params, f32, weights stored (in, out)."""
    assert len(input_dims) == 2, "kernel is specialized for 2 modalities"
    params = {}

    def linear(k, fan_in, fan_out):
        k1, k2 = jax.random.split(k)
        bound = 1.0 / (fan_in ** 0.5)
        w = jax.random.uniform(k1, (fan_in, fan_out), jnp.float32, -bound, bound)
        b = jax.random.uniform(k2, (1, fan_out), jnp.float32, -bound, bound)
        return w, b

    keys = jax.random.split(key, 2 * len(input_dims) + 2)
    for m, in_dim in enumerate(input_dims):
        params[f"w1_{m}"], params[f"b1_{m}"] = linear(keys[2 * m], in_dim, hidden_dim)
        params[f"w2_{m}"], params[f"b2_{m}"] = linear(keys[2 * m + 1], hidden_dim, encoded_dim)
    params["wc1"], params["bc1"] = linear(keys[-2], len(input_dims) * encoded_dim, hidden_dim)
    params["wc2"], params["bc2"] = linear(keys[-1], hidden_dim, 1)
    return params


def pack_params(raw, encoded_dim):
    """Per-modality weight slabs in bf16 (MXU dtype); biases stay f32 (VPU math)."""
    bf16 = jnp.bfloat16
    E = encoded_dim
    return {
        "w1_0": raw["w1_0"].astype(bf16), "b1_0": raw["b1_0"],
        "w1_1": raw["w1_1"].astype(bf16), "b1_1": raw["b1_1"],
        "w2_0": raw["w2_0"].astype(bf16), "b2_0": raw["b2_0"],
        "w2_1": raw["w2_1"].astype(bf16), "b2_1": raw["b2_1"],
        # cat([f0, f1], -1) @ wc1 == f0 @ wc1[:E] + f1 @ wc1[E:]  (exact row-slab split)
        "wc1a": raw["wc1"][:E].astype(bf16),
        "wc1b": raw["wc1"][E:].astype(bf16),
        "bc1": raw["bc1"],
        # Final layer stored as a (1, hidden) row for the lane-dense (1, B) matmul.
        "wc2": raw["wc2"].T.astype(bf16),
        "bc2": raw["bc2"],
    }


def reference_forward(inputs, raw):
    """Pure-JAX reference of the PyTorch forward (eval mode), same bf16-in / f32-acc precision."""
    bf16, f32 = jnp.bfloat16, jnp.float32
    feats = []
    for m, x in enumerate(inputs):
        h = jnp.dot(x.astype(bf16), raw[f"w1_{m}"].astype(bf16),
                    preferred_element_type=f32) + raw[f"b1_{m}"]
        h = jnp.maximum(h, 0.0)
        f = jnp.dot(h.astype(bf16), raw[f"w2_{m}"].astype(bf16),
                    preferred_element_type=f32) + raw[f"b2_{m}"]
        feats.append(f)
    c = jnp.maximum(jnp.concatenate(feats, axis=-1), 0.0)
    c = jnp.maximum(jnp.dot(c.astype(bf16), raw["wc1"].astype(bf16),
                            preferred_element_type=f32) + raw["bc1"], 0.0)
    out = jnp.dot(c.astype(bf16), raw["wc2"].astype(bf16),
                  preferred_element_type=f32) + raw["bc2"]
    return out[:, 0]


# ----------------------------- demo / test -----------------------------------


if __name__ == "__main__":
    B = 256
    input_dims = (16, 32)
    hidden_dim = 128              # module defaults
    encoded_dim = 64

    key = jax.random.PRNGKey(0)
    k_params, k_x0, k_x1 = jax.random.split(key, 3)
    raw = init_raw_params(k_params, input_dims, hidden_dim, encoded_dim)
    packed = pack_params(raw, encoded_dim)

    x0 = jax.random.normal(k_x0, (B, input_dims[0]), jnp.float32)
    x1 = jax.random.normal(k_x1, (B, input_dims[1]), jnp.float32)
    inputs = [x0, x1]

    ref = reference_forward(inputs, raw)

    # Single-tile path: default b_tile collapses the grid to one step (the common case).
    out1 = jax.block_until_ready(intermediate_integration_forward(inputs, packed))
    # Multi-tile path (2 grid steps) to exercise the batch-tiled pipeline.
    out2 = jax.block_until_ready(intermediate_integration_forward(inputs, packed, b_tile=128))

    assert out1.shape == (B,) and out2.shape == (B,)
    assert jnp.allclose(out1, ref, atol=1e-2, rtol=1e-2), (out1[:8], ref[:8])
    assert jnp.allclose(out2, ref, atol=1e-2, rtol=1e-2), (out2[:8], ref[:8])

    print("KERNEL_OK")
</pallas_src>

<mosaic_0001>
module attributes {stable_mosaic.version = 11 : i64} {
  func.func @_fusion_kernel(%arg0: i32, %arg1: memref<256x16xf32, #tpu.memory_space<vmem>>, %arg2: memref<256x32xf32, #tpu.memory_space<vmem>>, %arg3: memref<16x128xbf16, #tpu.memory_space<vmem>>, %arg4: memref<1x128xf32, #tpu.memory_space<vmem>>, %arg5: memref<32x128xbf16, #tpu.memory_space<vmem>>, %arg6: memref<1x128xf32, #tpu.memory_space<vmem>>, %arg7: memref<128x64xbf16, #tpu.memory_space<vmem>>, %arg8: memref<1x64xf32, #tpu.memory_space<vmem>>, %arg9: memref<128x64xbf16, #tpu.memory_space<vmem>>, %arg10: memref<1x64xf32, #tpu.memory_space<vmem>>, %arg11: memref<64x128xbf16, #tpu.memory_space<vmem>>, %arg12: memref<64x128xbf16, #tpu.memory_space<vmem>>, %arg13: memref<1x128xf32, #tpu.memory_space<vmem>>, %arg14: memref<1x128xbf16, #tpu.memory_space<vmem>>, %arg15: memref<1x1xf32, #tpu.memory_space<vmem>>, %arg16: memref<1x256xf32, #tpu.memory_space<vmem>>) attributes {dimension_semantics = [#tpu.dimension_semantics<parallel>], iteration_bounds = array<i64: 1>, scalar_prefetch = 0 : i64, scratch_operands = 0 : i64, tpu.core_type = #tpu.core_type<tc>, window_params = [{transform_indices = @transform_0, window_bounds = array<i64: 256, 16>}, {transform_indices = @transform_1, window_bounds = array<i64: 256, 32>}, {pipeline_mode = #tpu.pipeline_mode<synchronous>, transform_indices = @transform_2, window_bounds = array<i64: 16, 128>}, {pipeline_mode = #tpu.pipeline_mode<synchronous>, transform_indices = @transform_3, window_bounds = array<i64: 1, 128>}, {pipeline_mode = #tpu.pipeline_mode<synchronous>, transform_indices = @transform_4, window_bounds = array<i64: 32, 128>}, {pipeline_mode = #tpu.pipeline_mode<synchronous>, transform_indices = @transform_5, window_bounds = array<i64: 1, 128>}, {pipeline_mode = #tpu.pipeline_mode<synchronous>, transform_indices = @transform_6, window_bounds = array<i64: 128, 64>}, {pipeline_mode = #tpu.pipeline_mode<synchronous>, transform_indices = @transform_7, window_bounds = array<i64: 1, 64>}, {pipeline_mode = #tpu.pipeline_mode<synchronous>, transform_indices = @transform_8, window_bounds = array<i64: 128, 64>}, {pipeline_mode = #tpu.pipeline_mode<synchronous>, transform_indices = @transform_9, window_bounds = array<i64: 1, 64>}, {pipeline_mode = #tpu.pipeline_mode<synchronous>, transform_indices = @transform_10, window_bounds = array<i64: 64, 128>}, {pipeline_mode = #tpu.pipeline_mode<synchronous>, transform_indices = @transform_11, window_bounds = array<i64: 64, 128>}, {pipeline_mode = #tpu.pipeline_mode<synchronous>, transform_indices = @transform_12, window_bounds = array<i64: 1, 128>}, {pipeline_mode = #tpu.pipeline_mode<synchronous>, transform_indices = @transform_13, window_bounds = array<i64: 1, 128>}, {pipeline_mode = #tpu.pipeline_mode<synchronous>, transform_indices = @transform_14, window_bounds = array<i64: 1, 1>}, {transform_indices = @transform_15, window_bounds = array<i64: 1, 256>}]} {
    %c0 = arith.constant 0 : index
    %c0_0 = arith.constant 0 : index
    %0 = vector.load %arg1[%c0, %c0_0] : memref<256x16xf32, #tpu.memory_space<vmem>>, vector<256x16xf32>
    %1 = arith.truncf %0 : vector<256x16xf32> to vector<256x16xbf16>
    %c0_1 = arith.constant 0 : index
    %c0_2 = arith.constant 0 : index
    %2 = vector.load %arg2[%c0_1, %c0_2] : memref<256x32xf32, #tpu.memory_space<vmem>>, vector<256x32xf32>
    %3 = arith.truncf %2 : vector<256x32xf32> to vector<256x32xbf16>
    %c0_3 = arith.constant 0 : index
    %c0_4 = arith.constant 0 : index
    %4 = vector.load %arg3[%c0_3, %c0_4] : memref<16x128xbf16, #tpu.memory_space<vmem>>, vector<16x128xbf16>
    %cst = arith.constant dense<0.000000e+00> : vector<256x128xf32>
    %5 = tpu.matmul %1, %4, %cst {dimension_numbers = #tpu.dot_dimension_numbers<[1], [0], [0], [1], [0, 0, 1, 1], [], []>} : vector<256x16xbf16>, vector<16x128xbf16>, vector<256x128xf32> -> vector<256x128xf32>
    %c0_5 = arith.constant 0 : index
    %c0_6 = arith.constant 0 : index
    %6 = vector.load %arg4[%c0_5, %c0_6] : memref<1x128xf32, #tpu.memory_space<vmem>>, vector<1x128xf32>
    %7 = vector.broadcast %6 : vector<1x128xf32> to vector<256x128xf32>
    %8 = arith.addf %5, %7 : vector<256x128xf32>
    %c0_7 = arith.constant 0 : index
    %c0_8 = arith.constant 0 : index
    %9 = vector.load %arg5[%c0_7, %c0_8] : memref<32x128xbf16, #tpu.memory_space<vmem>>, vector<32x128xbf16>
    %cst_9 = arith.constant dense<0.000000e+00> : vector<256x128xf32>
    %10 = tpu.matmul %3, %9, %cst_9 {dimension_numbers = #tpu.dot_dimension_numbers<[1], [0], [0], [1], [0, 0, 1, 1], [], []>} : vector<256x32xbf16>, vector<32x128xbf16>, vector<256x128xf32> -> vector<256x128xf32>
    %c0_10 = arith.constant 0 : index
    %c0_11 = arith.constant 0 : index
    %11 = vector.load %arg6[%c0_10, %c0_11] : memref<1x128xf32, #tpu.memory_space<vmem>>, vector<1x128xf32>
    %12 = vector.broadcast %11 : vector<1x128xf32> to vector<256x128xf32>
    %13 = arith.addf %10, %12 : vector<256x128xf32>
    %cst_12 = arith.constant 0.000000e+00 : f32
    %14 = vector.broadcast %cst_12 : f32 to vector<256x128xf32>
    %15 = arith.maximumf %8, %14 : vector<256x128xf32>
    %cst_13 = arith.constant 0.000000e+00 : f32
    %16 = vector.broadcast %cst_13 : f32 to vector<256x128xf32>
    %17 = arith.maximumf %13, %16 : vector<256x128xf32>
    %18 = arith.truncf %15 : vector<256x128xf32> to vector<256x128xbf16>
    %c0_14 = arith.constant 0 : index
    %c0_15 = arith.constant 0 : index
    %19 = vector.load %arg7[%c0_14, %c0_15] : memref<128x64xbf16, #tpu.memory_space<vmem>>, vector<128x64xbf16>
    %cst_16 = arith.constant dense<0.000000e+00> : vector<256x64xf32>
    %20 = tpu.matmul %18, %19, %cst_16 {dimension_numbers = #tpu.dot_dimension_numbers<[1], [0], [0], [1], [0, 0, 1, 1], [], []>} : vector<256x128xbf16>, vector<128x64xbf16>, vector<256x64xf32> -> vector<256x64xf32>
    %c0_17 = arith.constant 0 : index
    %c0_18 = arith.constant 0 : index
    %21 = vector.load %arg8[%c0_17, %c0_18] : memref<1x64xf32, #tpu.memory_space<vmem>>, vector<1x64xf32>
    %22 = vector.broadcast %21 : vector<1x64xf32> to vector<256x64xf32>
    %23 = arith.addf %20, %22 : vector<256x64xf32>
    %24 = arith.truncf %17 : vector<256x128xf32> to vector<256x128xbf16>
    %c0_19 = arith.constant 0 : index
    %c0_20 = arith.constant 0 : index
    %25 = vector.load %arg9[%c0_19, %c0_20] : memref<128x64xbf16, #tpu.memory_space<vmem>>, vector<128x64xbf16>
    %cst_21 = arith.constant dense<0.000000e+00> : vector<256x64xf32>
    %26 = tpu.matmul %24, %25, %cst_21 {dimension_numbers = #tpu.dot_dimension_numbers<[1], [0], [0], [1], [0, 0, 1, 1], [], []>} : vector<256x128xbf16>, vector<128x64xbf16>, vector<256x64xf32> -> vector<256x64xf32>
    %c0_22 = arith.constant 0 : index
    %c0_23 = arith.constant 0 : index
    %27 = vector.load %arg10[%c0_22, %c0_23] : memref<1x64xf32, #tpu.memory_space<vmem>>, vector<1x64xf32>
    %28 = vector.broadcast %27 : vector<1x64xf32> to vector<256x64xf32>
    %29 = arith.addf %26, %28 : vector<256x64xf32>
    %cst_24 = arith.constant 0.000000e+00 : f32
    %30 = vector.broadcast %cst_24 : f32 to vector<256x64xf32>
    %31 = arith.maximumf %23, %30 : vector<256x64xf32>
    %32 = arith.truncf %31 : vector<256x64xf32> to vector<256x64xbf16>
    %cst_25 = arith.constant 0.000000e+00 : f32
    %33 = vector.broadcast %cst_25 : f32 to vector<256x64xf32>
    %34 = arith.maximumf %29, %33 : vector<256x64xf32>
    %35 = arith.truncf %34 : vector<256x64xf32> to vector<256x64xbf16>
    %c0_26 = arith.constant 0 : index
    %c0_27 = arith.constant 0 : index
    %36 = vector.load %arg11[%c0_26, %c0_27] : memref<64x128xbf16, #tpu.memory_space<vmem>>, vector<64x128xbf16>
    %cst_28 = arith.constant dense<0.000000e+00> : vector<256x128xf32>
    %37 = tpu.matmul %32, %36, %cst_28 {dimension_numbers = #tpu.dot_dimension_numbers<[1], [0], [0], [1], [0, 0, 1, 1], [], []>} : vector<256x64xbf16>, vector<64x128xbf16>, vector<256x128xf32> -> vector<256x128xf32>
    %c0_29 = arith.constant 0 : index
    %c0_30 = arith.constant 0 : index
    %38 = vector.load %arg12[%c0_29, %c0_30] : memref<64x128xbf16, #tpu.memory_space<vmem>>, vector<64x128xbf16>
    %cst_31 = arith.constant dense<0.000000e+00> : vector<256x128xf32>
    %39 = tpu.matmul %35, %38, %cst_31 {dimension_numbers = #tpu.dot_dimension_numbers<[1], [0], [0], [1], [0, 0, 1, 1], [], []>} : vector<256x64xbf16>, vector<64x128xbf16>, vector<256x128xf32> -> vector<256x128xf32>
    %40 = arith.addf %37, %39 : vector<256x128xf32>
    %c0_32 = arith.constant 0 : index
    %c0_33 = arith.constant 0 : index
    %41 = vector.load %arg13[%c0_32, %c0_33] : memref<1x128xf32, #tpu.memory_space<vmem>>, vector<1x128xf32>
    %42 = vector.broadcast %41 : vector<1x128xf32> to vector<256x128xf32>
    %43 = arith.addf %40, %42 : vector<256x128xf32>
    %cst_34 = arith.constant 0.000000e+00 : f32
    %44 = vector.broadcast %cst_34 : f32 to vector<256x128xf32>
    %45 = arith.maximumf %43, %44 : vector<256x128xf32>
    %46 = arith.truncf %45 : vector<256x128xf32> to vector<256x128xbf16>
    %c0_35 = arith.constant 0 : index
    %c0_36 = arith.constant 0 : index
    %47 = vector.load %arg14[%c0_35, %c0_36] : memref<1x128xbf16, #tpu.memory_space<vmem>>, vector<1x128xbf16>
    %cst_37 = arith.constant dense<0.000000e+00> : vector<1x256xf32>
    %48 = tpu.matmul %47, %46, %cst_37 {dimension_numbers = #tpu.dot_dimension_numbers<[1], [1], [0], [0], [0, 0, 1, 0], [], []>} : vector<1x128xbf16>, vector<256x128xbf16>, vector<1x256xf32> -> vector<1x256xf32>
    %c0_38 = arith.constant 0 : index
    %c0_39 = arith.constant 0 : index
    %49 = vector.load %arg15[%c0_38, %c0_39] : memref<1x1xf32, #tpu.memory_space<vmem>>, vector<1x1xf32>
    %50 = vector.broadcast %49 : vector<1x1xf32> to vector<1x256xf32>
    %51 = arith.addf %48, %50 : vector<1x256xf32>
    %c0_40 = arith.constant 0 : index
    %c0_41 = arith.constant 0 : index
    %52 = vector.load %arg16[%c0_40, %c0_41] : memref<1x256xf32, #tpu.memory_space<vmem>>, vector<1x256xf32>
    tpu.vector_store %arg16[%c0_40, %c0_41], %51 {strides = array<i32>} : memref<1x256xf32, #tpu.memory_space<vmem>>, vector<1x256xf32>,
    return
  }
  func.func @transform_0(%arg0: i32) -> (i32, i32) {
    %c0_i32 = arith.constant 0 : i32
    %c0_i32_0 = arith.constant 0 : i32
    return %arg0, %c0_i32 : i32, i32
  }
  func.func @transform_1(%arg0: i32) -> (i32, i32) {
    %c0_i32 = arith.constant 0 : i32
    %c0_i32_0 = arith.constant 0 : i32
    return %arg0, %c0_i32 : i32, i32
  }
  func.func @transform_2(%arg0: i32) -> (i32, i32) {
    %c0_i32 = arith.constant 0 : i32
    %c0_i32_0 = arith.constant 0 : i32
    %c0_i32_1 = arith.constant 0 : i32
    return %c0_i32, %c0_i32_0 : i32, i32
  }
  func.func @transform_3(%arg0: i32) -> (i32, i32) {
    %c0_i32 = arith.constant 0 : i32
    %c0_i32_0 = arith.constant 0 : i32
    %c0_i32_1 = arith.constant 0 : i32
    return %c0_i32, %c0_i32_0 : i32, i32
  }
  func.func @transform_4(%arg0: i32) -> (i32, i32) {
    %c0_i32 = arith.constant 0 : i32
    %c0_i32_0 = arith.constant 0 : i32
    %c0_i32_1 = arith.constant 0 : i32
    return %c0_i32, %c0_i32_0 : i32, i32
  }
  func.func @transform_5(%arg0: i32) -> (i32, i32) {
    %c0_i32 = arith.constant 0 : i32
    %c0_i32_0 = arith.constant 0 : i32
    %c0_i32_1 = arith.constant 0 : i32
    return %c0_i32, %c0_i32_0 : i32, i32
  }
  func.func @transform_6(%arg0: i32) -> (i32, i32) {
    %c0_i32 = arith.constant 0 : i32
    %c0_i32_0 = arith.constant 0 : i32
    %c0_i32_1 = arith.constant 0 : i32
    return %c0_i32, %c0_i32_0 : i32, i32
  }
  func.func @transform_7(%arg0: i32) -> (i32, i32) {
    %c0_i32 = arith.constant 0 : i32
    %c0_i32_0 = arith.constant 0 : i32
    %c0_i32_1 = arith.constant 0 : i32
    return %c0_i32, %c0_i32_0 : i32, i32
  }
  func.func @transform_8(%arg0: i32) -> (i32, i32) {
    %c0_i32 = arith.constant 0 : i32
    %c0_i32_0 = arith.constant 0 : i32
    %c0_i32_1 = arith.constant 0 : i32
    return %c0_i32, %c0_i32_0 : i32, i32
  }
  func.func @transform_9(%arg0: i32) -> (i32, i32) {
    %c0_i32 = arith.constant 0 : i32
    %c0_i32_0 = arith.constant 0 : i32
    %c0_i32_1 = arith.constant 0 : i32
    return %c0_i32, %c0_i32_0 : i32, i32
  }
  func.func @transform_10(%arg0: i32) -> (i32, i32) {
    %c0_i32 = arith.constant 0 : i32
    %c0_i32_0 = arith.constant 0 : i32
    %c0_i32_1 = arith.constant 0 : i32
    return %c0_i32, %c0_i32_0 : i32, i32
  }
  func.func @transform_11(%arg0: i32) -> (i32, i32) {
    %c0_i32 = arith.constant 0 : i32
    %c0_i32_0 = arith.constant 0 : i32
    %c0_i32_1 = arith.constant 0 : i32
    return %c0_i32, %c0_i32_0 : i32, i32
  }
  func.func @transform_12(%arg0: i32) -> (i32, i32) {
    %c0_i32 = arith.constant 0 : i32
    %c0_i32_0 = arith.constant 0 : i32
    %c0_i32_1 = arith.constant 0 : i32
    return %c0_i32, %c0_i32_0 : i32, i32
  }
  func.func @transform_13(%arg0: i32) -> (i32, i32) {
    %c0_i32 = arith.constant 0 : i32
    %c0_i32_0 = arith.constant 0 : i32
    %c0_i32_1 = arith.constant 0 : i32
    return %c0_i32, %c0_i32_0 : i32, i32
  }
  func.func @transform_14(%arg0: i32) -> (i32, i32) {
    %c0_i32 = arith.constant 0 : i32
    %c0_i32_0 = arith.constant 0 : i32
    %c0_i32_1 = arith.constant 0 : i32
    return %c0_i32, %c0_i32_0 : i32, i32
  }
  func.func @transform_15(%arg0: i32) -> (i32, i32) {
    %c0_i32 = arith.constant 0 : i32
    %c0_i32_0 = arith.constant 0 : i32
    return %c0_i32, %arg0 : i32, i32
  }
}

</mosaic_0001>

<bundles_post_ra>
// kernel: tpu_custom_call.1
= control target key start
LH: loop header
LB: loop body
LE: loop exit
PB: predicated region body
PF: predicated region fallthrough
CT: control target
= control target key end

     0   :  { %s3226_s0 = inlined_call_operand.vmem [shape: f32[256,16], index: 0, kind: input, shape index: {}]   ;;  %s3227_s1 = inlined_call_operand.vmem [shape: f32[256,32], index: 1, kind: input, shape index: {}]   ;;  %s3228_s2 = inlined_call_operand.vmem [shape: bf16[16,128], index: 2, kind: input, shape index: {}]   ;;  %s3229_s3 = inlined_call_operand.vmem [shape: f32[1,128], index: 3, kind: input, shape index: {}]   ;;  %s3230_s4 = inlined_call_operand.vmem [shape: bf16[32,128], index: 4, kind: input, shape index: {}]   ;;  %s3231_s5 = inlined_call_operand.vmem [shape: f32[1,128], index: 5, kind: input, shape index: {}]   ;;  %s3232_s6 = inlined_call_operand.vmem [shape: bf16[128,64], index: 6, kind: input, shape index: {}]   ;;  %s3233_s7 = inlined_call_operand.vmem [shape: f32[1,64], index: 7, kind: input, shape index: {}]   ;;  %s3234_s8 = inlined_call_operand.vmem [shape: bf16[128,64], index: 8, kind: input, shape index: {}]   ;;  %s3235_s9 = inlined_call_operand.vmem [shape: f32[1,64], index: 9, kind: input, shape index: {}]   ;;  %s3236_s10 = inlined_call_operand.vmem [shape: bf16[64,128], index: 10, kind: input, shape index: {}]   ;;  %s3237_s11 = inlined_call_operand.vmem [shape: bf16[64,128], index: 11, kind: input, shape index: {}]   ;;  %s3238_s12 = inlined_call_operand.vmem [shape: f32[1,128], index: 12, kind: input, shape index: {}]   ;;  %s3239_s13 = inlined_call_operand.vmem [shape: bf16[1,128], index: 13, kind: input, shape index: {}]   ;;  %s3240_s14 = inlined_call_operand.<no memory space> [shape: f32[1,1], index: 14, kind: input, shape index: {}]   ;;  %s3241_s15 = inlined_call_operand.hbm [shape: f32[1,256], index: 15, kind: output, shape index: {}]  }
   0x1   :  { %v20_v0 = vstv %s3240_s14 }
   0x2   :  { %21 = vst [vmem:[#allocation2] sm:$0x1] %v20_v0 }
   0x3   :  { %v2442_v1 = vld [vmem:[%s3228_s2] sm:$0xff]   ;;  %v55_v3 = vld [vmem:[%s3226_s0 + $0x8] sm:$0xff]  ;;  %vm165_vm0 = vcmask 130048   ;;  %v56_v4 = vld [vmem:[%s3226_s0 + $0x10] sm:$0xff]  ;;  %vm398_vm1 = vcmask 261120  }
   0x4   :  { %v54_v2 = vld [vmem:[%s3226_s0] sm:$0xff]  ;;  %2160 = vmatprep.subr.bf16.mxu0 %v2442_v1  ;;  %v57_v6 = vld [vmem:[%s3226_s0 + $0x18] sm:$0xff]  ;;  %v59_v8 = vld [vmem:[%s3226_s0 + $0x28] sm:$0xff] }
   0x5   :  { %v86_v5 = vpack.c.bf16 %v55_v3, %v54_v2  ;;  %v58_v7 = vld [vmem:[%s3226_s0 + $0x20] sm:$0xff]  ;;  %2161 = vmatpush3.bf16.msra.mxu0 %v2442_v1  ;;  %v87_v9 = vpack.c.bf16 %v57_v6, %v56_v4  ;;  %v60_v11 = vld [vmem:[%s3226_s0 + $0x30] sm:$0xff]  ;;  %v61_v12 = vld [vmem:[%s3226_s0 + $0x38] sm:$0xff] }
   0x6   :  { %v88_v10 = vpack.c.bf16 %v59_v8, %v58_v7  ;;  %v62_v13 = vld [vmem:[%s3226_s0 + $0x40] sm:$0xff]  ;;  %v63_v14 = vld [vmem:[%s3226_s0 + $0x48] sm:$0xff]  ;;  %v89_v15 = vpack.c.bf16 %v61_v12, %v60_v11  ;;  %v64_v18 = vld [vmem:[%s3226_s0 + $0x50] sm:$0xff] }
   0x7   :  { %2162 = vmatprep.mubr.msk.bf16.mxu0 %vm165_vm0, %v86_v5  ;;  %v90_v16 = vpack.c.bf16 %v63_v14, %v62_v13  ;;  %v2443_v17 = vld [vmem:[%s3230_s4] sm:$0xff]   ;;  %v2444_v19 = vld [vmem:[%s3230_s4 + $0x8] sm:$0xff]   ;;  %v104_v22 = vld [vmem:[%s3227_s1 + $0x10] sm:$0xff] }
   0x8   :  { %2163 = vmatmul.mubr.msk.bf16.vlgmr.msra.gmra.mrb[0].mxu0 %vm165_vm0, %v87_v9  ;;  %2194 = vmatprep.subr.bf16.mxu1 %v2443_v17  ;;  %v102_v20 = vld [vmem:[%s3227_s1] sm:$0xff]  ;;  %v103_v21 = vld [vmem:[%s3227_s1 + $0x8] sm:$0xff]  ;;  %v105_v23 = vld [vmem:[%s3227_s1 + $0x18] sm:$0xff] }
   0x9   :  { %2166 = vmatprep.mubr.msk.bf16.mxu0 %vm165_vm0, %v88_v10  ;;  %2195 = vmatpush3.bf16.msra.mxu1 %v2443_v17  ;;  %v65_v24 = vld [vmem:[%s3226_s0 + $0x58] sm:$0xff]  ;;  %v134_v25 = vpack.c.bf16 %v103_v21, %v102_v20  ;;  %v106_v26 = vld [vmem:[%s3227_s1 + $0x20] sm:$0xff]  ;;  %v107_v27 = vld [vmem:[%s3227_s1 + $0x28] sm:$0xff]  ;;  %v135_v30 = vpack.c.bf16 %v105_v23, %v104_v22 }
   0xa   :  { %2196 = vmatprep.subr.bf16.mxu1 %v2444_v19  ;;  %v66_v28 = vld [vmem:[%s3226_s0 + $0x60] sm:$0xff]  ;;  %v67_v29 = vld [vmem:[%s3226_s0 + $0x68] sm:$0xff]  ;;  %v91_v31 = vpack.c.bf16 %v65_v24, %v64_v18  ;;  %v136_v32 = vpack.c.bf16 %v107_v27, %v106_v26  ;;  %v68_v34 = vld [vmem:[%s3226_s0 + $0x70] sm:$0xff] }
   0xb   :  { %2198 = vmatprep.mubr.msk.bf16.mxu1 %vm398_vm1, %v134_v25  ;;  %v92_v33 = vpack.c.bf16 %v67_v29, %v66_v28  ;;  %v69_v35 = vld [vmem:[%s3226_s0 + $0x78] sm:$0xff]  ;;  %v108_v36 = vld [vmem:[%s3227_s1 + $0x30] sm:$0xff]  ;;  %v70_v38 = vld [vmem:[%s3226_s0 + $0x80] sm:$0xff] }
   0xc   :  { %v109_v37 = vld [vmem:[%s3227_s1 + $0x38] sm:$0xff]  ;;  %v110_v39 = vld [vmem:[%s3227_s1 + $0x40] sm:$0xff]  ;;  %v111_v40 = vld [vmem:[%s3227_s1 + $0x48] sm:$0xff]  ;;  %v93_v44 = vpack.c.bf16 %v69_v35, %v68_v34 }
   0xd   :  { %2197 = vmatpush3.bf16.msra.mxu1 %v2444_v19  ;;  %v71_v41 = vld [vmem:[%s3226_s0 + $0x88] sm:$0xff]  ;;  %v137_v42 = vpack.c.bf16 %v109_v37, %v108_v36  ;;  %v2445_v43 = vld [vmem:[%s3232_s6] sm:$0xff]   ;;  %v138_v45 = vpack.c.bf16 %v111_v40, %v110_v39  ;;  %v112_v48 = vld [vmem:[%s3227_s1 + $0x50] sm:$0xff] }
   0xe   :  { %v2446_v46 = vld [vmem:[%s3232_s6 + $0x8] sm:$0xff]   ;;  %v94_v47 = vpack.c.bf16 %v71_v41, %v70_v38  ;;  %2230 = vmatprep.subr.bf16.mxu1 %v2445_v43  ;;  %v113_v49 = vld [vmem:[%s3227_s1 + $0x58] sm:$0xff]  ;;  %v72_v50 = vld [vmem:[%s3226_s0 + $0x90] sm:$0xff] }
   0xf   :  { %v73_v51 = vld [vmem:[%s3226_s0 + $0x98] sm:$0xff]  ;;  %v114_v52 = vld [vmem:[%s3227_s1 + $0x60] sm:$0xff]  ;;  %v2447_v53 = vld [vmem:[%s3232_s6 + $0x10] sm:$0xff]   ;;  %v139_v58 = vpack.c.bf16 %v113_v49, %v112_v48 }
  0x10   :  { %2167 = vmatmul.mubr.msk.bf16.gmra.mrb[4].mxu0 %vm165_vm0, %v89_v15  ;;  %2199 = vmatmul.mubr.msk.bf16.vlgmr.msra.gmra.mrb[0].mxu1 %vm398_vm1, %v135_v30  ;;  %v74_v54 = vld [vmem:[%s3226_s0 + $0xa0] sm:$0xff]  ;;  %v75_v55 = vld [vmem:[%s3226_s0 + $0xa8] sm:$0xff]  ;;  %v2448_v57 = vld [vmem:[%s3232_s6 + $0x18] sm:$0xff]   ;;  %v95_v59 = vpack.c.bf16 %v73_v51, %v72_v50 }
  0x11   :  { %2170 = vmatprep.mubr.msk.bf16.mxu0 %vm165_vm0, %v90_v16  ;;  %2202 = vmatprep.mubr.msk.bf16.mxu1 %vm398_vm1, %v136_v32  ;;  %v115_v56 = vld [vmem:[%s3227_s1 + $0x68] sm:$0xff]  ;;  %v96_v61 = vpack.c.bf16 %v75_v55, %v74_v54  ;;  %v2449_v62 = vld [vmem:[%s3232_s6 + $0x20] sm:$0xff]   ;;  %v116_v63 = vld [vmem:[%s3227_s1 + $0x70] sm:$0xff] }
  0x12   :  { %2231 = vmatpush3.bf16.msra.mxu1 %v2445_v43  ;;  %v140_v60 = vpack.c.bf16 %v115_v56, %v114_v52  ;;  %v117_v0 = vld [vmem:[%s3227_s1 + $0x78] sm:$0xff]  ;;  %v76_v1 = vld [vmem:[%s3226_s0 + $0xb0] sm:$0xff]  ;;  %v118_v3 = vld [vmem:[%s3227_s1 + $0x80] sm:$0xff] }
  0x13   :  { %2232 = vmatprep.subr.bf16.mxu1 %v2446_v46  ;;  %v77_v2 = vld [vmem:[%s3226_s0 + $0xb8] sm:$0xff]  ;;  %v119_v4 = vld [vmem:[%s3227_s1 + $0x88] sm:$0xff]  ;;  %v78_v5 = vld [vmem:[%s3226_s0 + $0xc0] sm:$0xff]  ;;  %v141_v8 = vpack.c.bf16 %v117_v0, %v116_v63 }
  0x14   :  { %v79_v6 = vld [vmem:[%s3226_s0 + $0xc8] sm:$0xff]  ;;  %v97_v9 = vpack.c.bf16 %v77_v2, %v76_v1  ;;  %v142_v10 = vpack.c.bf16 %v119_v4, %v118_v3 }
  0x15   :  { %v2450_v7 = vld [vmem:[%s3232_s6 + $0x28] sm:$0xff]  }
  0x16   :  { %2233 = vmatpush3.bf16.msra.mxu1 %v2446_v46 }
  0x17   :  { %2234 = vmatprep.subr.bf16.mxu1 %v2447_v53 }
  0x18   :  { %2171 = vmatmul.mubr.msk.bf16.gmra.mrb[8].mxu0 %vm165_vm0, %v91_v31  ;;  %2203 = vmatmul.mubr.msk.bf16.gmra.mrb[4].mxu1 %vm398_vm1, %v137_v42 }
  0x19   :  { %2174 = vmatprep.mubr.msk.bf16.mxu0 %vm165_vm0, %v92_v33  ;;  %2206 = vmatprep.mubr.msk.bf16.mxu1 %vm398_vm1, %v138_v45 }
  0x1a   :  { %2235 = vmatpush3.bf16.msra.mxu1 %v2447_v53 }
  0x1b   :  { %2236 = vmatprep.subr.bf16.mxu1 %v2448_v57 }
  0x1e   :  { %2237 = vmatpush3.bf16.msra.mxu1 %v2448_v57 }
  0x1f   :  { %2238 = vmatprep.subr.bf16.mxu1 %v2449_v62 }
  0x20   :  { %2175 = vmatmul.mubr.msk.bf16.gmra.mrb[12].mxu0 %vm165_vm0, %v93_v44  ;;  %2207 = vmatmul.mubr.msk.bf16.gmra.mrb[8].mxu1 %vm398_vm1, %v139_v58 }
  0x21   :  { %2178 = vmatprep.mubr.msk.bf16.mxu0 %vm165_vm0, %v94_v47  ;;  %2210 = vmatprep.mubr.msk.bf16.mxu1 %vm398_vm1, %v140_v60 }
  0x28   :  { %2179 = vmatmul.mubr.msk.bf16.gmra.mrb[16].mxu0 %vm165_vm0, %v95_v59 }
  0x29   :  { %2182 = vmatprep.mubr.msk.bf16.mxu0 %vm165_vm0, %v96_v61 }
  0x2a   :  { %22 = vsyncpa [#allocation4], 0  ;;  %v98_v11 = vpack.c.bf16 %v79_v6, %v78_v5  ;;  %2239 = vmatpush3.bf16.msra.mxu1 %v2449_v62  ;;  %v2451_v12 = vld [vmem:[%s3232_s6 + $0x30] sm:$0xff]   ;;  %v121_v15 = vld [vmem:[%s3227_s1 + $0x98] sm:$0xff]  ;;  %vm1304_vm2 = vcmask 523264  }
  0x2b   :  { %2211 = vmatmul.mubr.msk.bf16.gmra.mrb[12].mxu1 %vm398_vm1, %v141_v8  ;;  %2240 = vmatprep.subr.bf16.mxu1 %v2450_v7  ;;  %v80_v13 = vld [vmem:[%s3226_s0 + $0xd0] sm:$0xff]  ;;  %v81_v16 = vld [vmem:[%s3226_s0 + $0xd8] sm:$0xff]  ;;  %v122_v17 = vld [vmem:[%s3227_s1 + $0xa0] sm:$0xff] }
  0x2c   :  { %2214 = vmatprep.mubr.msk.bf16.mxu1 %vm398_vm1, %v142_v10  ;;  %v120_v14 = vld [vmem:[%s3227_s1 + $0x90] sm:$0xff]  ;;  %v123_v18 = vld [vmem:[%s3227_s1 + $0xa8] sm:$0xff]  ;;  %v82_v19 = vld [vmem:[%s3226_s0 + $0xe0] sm:$0xff]  ;;  %v99_v22 = vpack.c.bf16 %v81_v16, %v80_v13 }
  0x2d   :  { %v83_v20 = vld [vmem:[%s3226_s0 + $0xe8] sm:$0xff]  ;;  %v143_v21 = vpack.c.bf16 %v121_v15, %v120_v14  ;;  %v144_v23 = vpack.c.bf16 %v123_v18, %v122_v17  ;;  %v84_v25 = vld [vmem:[%s3226_s0 + $0xf0] sm:$0xff]  ;;  %v125_v27 = vld [vmem:[%s3227_s1 + $0xb8] sm:$0xff] }
  0x2e   :  { %2241 = vmatpush3.bf16.msra.mxu1 %v2450_v7  ;;  %v100_v24 = vpack.c.bf16 %v83_v20, %v82_v19  ;;  %v124_v26 = vld [vmem:[%s3227_s1 + $0xb0] sm:$0xff]  ;;  %v85_v28 = vld [vmem:[%s3226_s0 + $0xf8] sm:$0xff]  ;;  %v126_v29 = vld [vmem:[%s3227_s1 + $0xc0] sm:$0xff] }
  0x2f   :  { %2242 = vmatprep.subr.bf16.mxu1 %v2451_v12  ;;  %v127_v30 = vld [vmem:[%s3227_s1 + $0xc8] sm:$0xff]  ;;  %v145_v31 = vpack.c.bf16 %v125_v27, %v124_v26  ;;  %v101_v32 = vpack.c.bf16 %v85_v28, %v84_v25  ;;  %v128_v34 = vld [vmem:[%s3227_s1 + $0xd0] sm:$0xff]  ;;  %v129_v35 = vld [vmem:[%s3227_s1 + $0xd8] sm:$0xff] }
  0x30   :  { %2183 = vmatmul.mubr.msk.bf16.gmra.mrb[20].mxu0 %vm165_vm0, %v97_v9  ;;  %v146_v33 = vpack.c.bf16 %v127_v30, %v126_v29  ;;  %v130_v36 = vld [vmem:[%s3227_s1 + $0xe0] sm:$0xff]  ;;  %v131_v37 = vld [vmem:[%s3227_s1 + $0xe8] sm:$0xff]  ;;  %v147_v38 = vpack.c.bf16 %v129_v35, %v128_v34  ;;  %v132_v40 = vld [vmem:[%s3227_s1 + $0xf0] sm:$0xff] }
  0x31   :  { %2186 = vmatprep.mubr.msk.bf16.mxu0 %vm165_vm0, %v98_v11  ;;  %v148_v39 = vpack.c.bf16 %v131_v37, %v130_v36  ;;  %v133_v41 = vld [vmem:[%s3227_s1 + $0xf8] sm:$0xff]  ;;  %v2453_v44 = vld [vmem:[%s3234_s8] sm:$0xff]   ;;  %v2454_v63 = vld [vmem:[%s3234_s8 + $0x8] sm:$0xff]  }
  0x32   :  { %2243 = vmatpush3.bf16.msra.mxu1 %v2451_v12  ;;  %v149_v42 = vpack.c.bf16 %v133_v41, %v132_v40  ;;  %v2452_v43 = vld [vmem:[%s3232_s6 + $0x38] sm:$0xff]   ;;  %v2842_v45 = vld [vmem:[%s3229_s3] ss:$0 sm:$0xff]  ;;  %v2455_v7 = vld [vmem:[%s3234_s8 + $0x10] sm:$0xff]  }
  0x33   :  { %2215 = vmatmul.mubr.msk.bf16.gmra.mrb[16].mxu1 %vm398_vm1, %v143_v21  ;;  %2244 = vmatprep.subr.bf16.mxu1 %v2452_v43  ;;  %v2861_v8 = vld [vmem:[%s3231_s5] ss:$0 sm:$0xff]  ;;  %v2456_v19 = vld [vmem:[%s3234_s8 + $0x18] sm:$0xff]  }
  0x34   :  { %2218 = vmatprep.mubr.msk.bf16.mxu1 %vm398_vm1, %v144_v23  ;;  %v2457_v35 = vld [vmem:[%s3234_s8 + $0x20] sm:$0xff]  }
  0x36   :  { %2245 = vmatpush3.bf16.msra.mxu1 %v2452_v43 }
  0x37   :  { %2278 = vmatprep.subr.bf16.mxu1 %v2453_v44 }
  0x38   :  { %2187 = vmatmul.mubr.msk.bf16.gmra.mrb[24].mxu0 %vm165_vm0, %v99_v22 }
  0x39   :  { %2190 = vmatprep.mubr.msk.bf16.mxu0 %vm165_vm0, %v100_v24 }
  0x3b   :  { %2219 = vmatmul.mubr.msk.bf16.gmra.mrb[20].mxu1 %vm398_vm1, %v145_v31 }
  0x3c   :  { %2222 = vmatprep.mubr.msk.bf16.mxu1 %vm398_vm1, %v146_v33 }
  0x40   :  { %2191 = vmatmul.mubr.msk.bf16.gmra.mrb[28].mxu0 %vm165_vm0, %v101_v32 }
  0x43   :  { %2223 = vmatmul.mubr.msk.bf16.gmra.mrb[24].mxu1 %vm398_vm1, %v147_v38 }
  0x44   :  { %2226 = vmatprep.mubr.msk.bf16.mxu1 %vm398_vm1, %v148_v39 }
  0x4b   :  { %2227 = vmatmul.mubr.msk.bf16.gmra.mrb[28].mxu1 %vm398_vm1, %v149_v42 }
  0xdb   :  { %v2164_v46 = vpop.f32.mrb[0].mxu0 }
  0xdc   :  { %v257_v47 = vadd.f32 %v2164_v46, %v2842_v45  ;;  %v248_v48 = vpop.f32.mrb[1].mxu0 }
  0xdd   :  { %v249_v49 = vadd.f32 %v2842_v45, %v248_v48  ;;  %v2165_v50 = vpop.f32.mrb[2].mxu0 }
  0xde   :  { %v260_v51 = vadd.f32 %v2165_v50, %v2842_v45  ;;  %v251_v52 = vpop.f32.mrb[3].mxu0  ;;  %v610_v54 = vmax.f32 %v257_v47, 0.0  ;;  %v2458_v50 = vld [vmem:[%s3234_s8 + $0x28] sm:$0xff]  }
  0xdf   :  { %v252_v53 = vadd.f32 %v2842_v45, %v251_v52  ;;  %v608_v56 = vmax.f32 %v249_v49, 0.0 }
  0xe0   :  { %v611_v55 = vmax.f32 %v260_v51, 0.0 }
  0xe1   :  { %v609_v57 = vmax.f32 %v252_v53, 0.0 }
  0xe2   :  { %v673_v58 = vpack.c.bf16 %v611_v55, %v610_v54 }
  0xe3   :  { %v672_v59 = vpack.c.bf16 %v609_v57, %v608_v56  ;;  %v2168_v60 = vpop.f32.mrb[4].mxu0  ;;  %v2200_v12 = vpop.f32.mrb[0].mxu1 }
  0xe4   :  { %v273_v61 = vadd.f32 %v2168_v60, %v2842_v45  ;;  %v264_v62 = vpop.f32.mrb[5].mxu0  ;;  %v490_v15 = vadd.f32 %v2200_v12, %v2861_v8  ;;  %v481_v16 = vpop.f32.mrb[1].mxu1 }
  0xe5   :  { %v265_v0 = vadd.f32 %v2842_v45, %v264_v62  ;;  %v2169_v1 = vpop.f32.mrb[6].mxu0  ;;  %2246 = vmatprep.mubr.bf16.mxu1 %v672_v59  ;;  %v482_v20 = vadd.f32 %v2861_v8, %v481_v16  ;;  %v2201_v21 = vpop.f32.mrb[2].mxu1 }
  0xe6   :  { %v276_v2 = vadd.f32 %v2169_v1, %v2842_v45  ;;  %v267_v3 = vpop.f32.mrb[7].mxu0  ;;  %2247 = vmatmul.mubr.bf16.vlgmr.msra.gmra.mrb[32].mxu1 %v673_v58  ;;  %v614_v5 = vmax.f32 %v273_v61, 0.0  ;;  %v642_v24 = vmax.f32 %v490_v15, 0.0  ;;  %v493_v25 = vadd.f32 %v2201_v21, %v2861_v8  ;;  %v484_v26 = vpop.f32.mrb[3].mxu1 }
  0xe7   :  { %v268_v4 = vadd.f32 %v2842_v45, %v267_v3  ;;  %2279 = vmatpush3.bf16.msra.mxu1 %v2453_v44  ;;  %v612_v9 = vmax.f32 %v265_v0, 0.0  ;;  %v640_v29 = vmax.f32 %v482_v20, 0.0  ;;  %v485_v30 = vadd.f32 %v2861_v8, %v484_v26 }
  0xe8   :  { %v615_v6 = vmax.f32 %v276_v2, 0.0  ;;  %2280 = vmatprep.subr.bf16.mxu1 %v2454_v63  ;;  %v643_v32 = vmax.f32 %v493_v25, 0.0  ;;  %v2459_v2 = vld [vmem:[%s3234_s8 + $0x30] sm:$0xff]  }
  0xe9   :  { %v613_v10 = vmax.f32 %v268_v4, 0.0  ;;  %v641_v36 = vmax.f32 %v485_v30, 0.0 }
  0xea   :  { %v675_v11 = vpack.c.bf16 %v615_v6, %v614_v5  ;;  %v2877_v39 = vpack.c.bf16 %v643_v32, %v642_v24 }
  0xeb   :  { %v674_v13 = vpack.c.bf16 %v613_v10, %v612_v9  ;;  %v2172_v14 = vpop.f32.mrb[8].mxu0  ;;  %2281 = vmatpush3.bf16.msra.mxu1 %v2454_v63  ;;  %v2879_v41 = vpack.c.bf16 %v641_v36, %v640_v29  ;;  %v2204_v42 = vpop.f32.mrb[4].mxu1 }
  0xec   :  { %v289_v17 = vadd.f32 %v2172_v14, %v2842_v45  ;;  %v280_v18 = vpop.f32.mrb[9].mxu0  ;;  %2282 = vmatprep.subr.bf16.mxu1 %v2455_v7  ;;  %v506_v46 = vadd.f32 %v2204_v42, %v2861_v8  ;;  %v497_v47 = vpop.f32.mrb[5].mxu1 }
  0xed   :  { %v281_v22 = vadd.f32 %v2842_v45, %v280_v18  ;;  %v2173_v23 = vpop.f32.mrb[10].mxu0  ;;  %2250 = vmatprep.mubr.bf16.mxu1 %v674_v13  ;;  %v498_v51 = vadd.f32 %v2861_v8, %v497_v47  ;;  %v2205_v52 = vpop.f32.mrb[6].mxu1 }
  0xee   :  { %v292_v27 = vadd.f32 %v2173_v23, %v2842_v45  ;;  %v283_v28 = vpop.f32.mrb[11].mxu0  ;;  %2251 = vmatmul.mubr.bf16.gmra.mrb[36].mxu1 %v675_v11  ;;  %v618_v33 = vmax.f32 %v289_v17, 0.0  ;;  %v646_v55 = vmax.f32 %v506_v46, 0.0  ;;  %v509_v56 = vadd.f32 %v2205_v52, %v2861_v8  ;;  %v500_v57 = vpop.f32.mrb[7].mxu1  ;;  %v2460_v17 = vld [vmem:[%s3234_s8 + $0x38] sm:$0xff]  }
  0xef   :  { %v284_v31 = vadd.f32 %v2842_v45, %v283_v28  ;;  %2283 = vmatpush3.bf16.msra.mxu1 %v2455_v7  ;;  %v616_v37 = vmax.f32 %v281_v22, 0.0  ;;  %v644_v60 = vmax.f32 %v498_v51, 0.0  ;;  %v501_v61 = vadd.f32 %v2861_v8, %v500_v57 }
  0xf0   :  { %v619_v34 = vmax.f32 %v292_v27, 0.0  ;;  %2284 = vmatprep.subr.bf16.mxu1 %v2456_v19  ;;  %v647_v63 = vmax.f32 %v509_v56, 0.0 }
  0xf1   :  { %v617_v38 = vmax.f32 %v284_v31, 0.0  ;;  %v645_v3 = vmax.f32 %v501_v61, 0.0 }
  0xf2   :  { %v677_v40 = vpack.c.bf16 %v619_v34, %v618_v33  ;;  %v2895_v6 = vpack.c.bf16 %v647_v63, %v646_v55 }
  0xf3   :  { %v676_v43 = vpack.c.bf16 %v617_v38, %v616_v37  ;;  %v2176_v44 = vpop.f32.mrb[12].mxu0  ;;  %2285 = vmatpush3.bf16.msra.mxu1 %v2456_v19  ;;  %v2897_v9 = vpack.c.bf16 %v645_v3, %v644_v60  ;;  %v2208_v10 = vpop.f32.mrb[8].mxu1 }
  0xf4   :  { %v305_v48 = vadd.f32 %v2176_v44, %v2842_v45  ;;  %v296_v49 = vpop.f32.mrb[13].mxu0  ;;  %2286 = vmatprep.subr.bf16.mxu1 %v2457_v35  ;;  %v522_v13 = vadd.f32 %v2208_v10, %v2861_v8  ;;  %v513_v14 = vpop.f32.mrb[9].mxu1 }
  0xf5   :  { %v297_v53 = vadd.f32 %v2842_v45, %v296_v49  ;;  %v2177_v54 = vpop.f32.mrb[14].mxu0  ;;  %2254 = vmatprep.mubr.bf16.mxu1 %v676_v43  ;;  %v514_v18 = vadd.f32 %v2861_v8, %v513_v14  ;;  %v2209_v19 = vpop.f32.mrb[10].mxu1 }
  0xf6   :  { %v308_v58 = vadd.f32 %v2177_v54, %v2842_v45  ;;  %v299_v59 = vpop.f32.mrb[15].mxu0  ;;  %2255 = vmatmul.mubr.bf16.gmra.mrb[40].mxu1 %v677_v40  ;;  %v622_v0 = vmax.f32 %v305_v48, 0.0  ;;  %v650_v22 = vmax.f32 %v522_v13, 0.0  ;;  %v525_v23 = vadd.f32 %v2209_v19, %v2861_v8  ;;  %v516_v24 = vpop.f32.mrb[11].mxu1 }
  0xf7   :  { %v300_v62 = vadd.f32 %v2842_v45, %v299_v59  ;;  %2287 = vmatpush3.bf16.msra.mxu1 %v2457_v35  ;;  %v620_v4 = vmax.f32 %v297_v53, 0.0  ;;  %v648_v27 = vmax.f32 %v514_v18, 0.0  ;;  %v517_v28 = vadd.f32 %v2861_v8, %v516_v24 }
  0xf8   :  { %v623_v1 = vmax.f32 %v308_v58, 0.0  ;;  %2288 = vmatprep.subr.bf16.mxu1 %v2458_v50  ;;  %v651_v30 = vmax.f32 %v525_v23, 0.0 }
  0xf9   :  { %v621_v5 = vmax.f32 %v300_v62, 0.0  ;;  %v649_v33 = vmax.f32 %v517_v28, 0.0 }
  0xfa   :  { %v679_v7 = vpack.c.bf16 %v623_v1, %v622_v0  ;;  %v2910_v36 = vpack.c.bf16 %v651_v30, %v650_v22 }
  0xfb   :  { %v678_v11 = vpack.c.bf16 %v621_v5, %v620_v4  ;;  %v2180_v12 = vpop.f32.mrb[16].mxu0  ;;  %2289 = vmatpush3.bf16.msra.mxu1 %v2458_v50  ;;  %v2912_v38 = vpack.c.bf16 %v649_v33, %v648_v27 }
  0xfc   :  { %v321_v15 = vadd.f32 %v2180_v12, %v2842_v45  ;;  %v312_v16 = vpop.f32.mrb[17].mxu0  ;;  %2290 = vmatprep.subr.bf16.mxu1 %v2459_v2 }
  0xfd   :  { %v313_v20 = vadd.f32 %v2842_v45, %v312_v16  ;;  %v2181_v21 = vpop.f32.mrb[18].mxu0  ;;  %2258 = vmatprep.mubr.bf16.mxu1 %v678_v11 }
  0xfe   :  { %v324_v25 = vadd.f32 %v2181_v21, %v2842_v45  ;;  %v315_v26 = vpop.f32.mrb[19].mxu0  ;;  %2259 = vmatmul.mubr.bf16.gmra.mrb[44].mxu1 %v679_v7  ;;  %v626_v31 = vmax.f32 %v321_v15, 0.0  ;;  %v2212_v40 = vpop.f32.mrb[12].mxu1 }
  0xff   :  { %v316_v29 = vadd.f32 %v2842_v45, %v315_v26  ;;  %2291 = vmatpush3.bf16.msra.mxu1 %v2459_v2  ;;  %v624_v34 = vmax.f32 %v313_v20, 0.0  ;;  %v538_v44 = vadd.f32 %v2212_v40, %v2861_v8  ;;  %v529_v46 = vpop.f32.mrb[13].mxu1 }
 0x100   :  { %v627_v32 = vmax.f32 %v324_v25, 0.0  ;;  %2292 = vmatprep.subr.bf16.mxu1 %v2460_v17  ;;  %v530_v49 = vadd.f32 %v2861_v8, %v529_v46  ;;  %v2213_v50 = vpop.f32.mrb[14].mxu1 }
 0x101   :  { %v625_v35 = vmax.f32 %v316_v29, 0.0  ;;  %v654_v53 = vmax.f32 %v538_v44, 0.0  ;;  %v541_v54 = vadd.f32 %v2213_v50, %v2861_v8  ;;  %v532_v55 = vpop.f32.mrb[15].mxu1 }
 0x102   :  { %v681_v37 = vpack.c.bf16 %v627_v32, %v626_v31  ;;  %v652_v58 = vmax.f32 %v530_v49, 0.0  ;;  %v533_v59 = vadd.f32 %v2861_v8, %v532_v55 }
 0x103   :  { %v680_v42 = vpack.c.bf16 %v625_v35, %v624_v34  ;;  %v2184_v43 = vpop.f32.mrb[20].mxu0  ;;  %2293 = vmatpush3.bf16.msra.mxu1 %v2460_v17  ;;  %v655_v61 = vmax.f32 %v541_v54, 0.0 }
 0x104   :  { %v337_v47 = vadd.f32 %v2184_v43, %v2842_v45  ;;  %v328_v48 = vpop.f32.mrb[21].mxu0  ;;  %v653_v0 = vmax.f32 %v533_v59, 0.0 }
 0x105   :  { %v329_v51 = vadd.f32 %v2842_v45, %v328_v48  ;;  %v2185_v52 = vpop.f32.mrb[22].mxu0  ;;  %2262 = vmatprep.mubr.bf16.mxu1 %v680_v42  ;;  %v2922_v3 = vpack.c.bf16 %v655_v61, %v654_v53 }
 0x106   :  { %v340_v56 = vadd.f32 %v2185_v52, %v2842_v45  ;;  %v331_v57 = vpop.f32.mrb[23].mxu0  ;;  %2263 = vmatmul.mubr.bf16.gmra.mrb[48].mxu1 %v681_v37  ;;  %v630_v62 = vmax.f32 %v337_v47, 0.0  ;;  %v2924_v5 = vpack.c.bf16 %v653_v0, %v652_v58  ;;  %v2216_v7 = vpop.f32.mrb[16].mxu1 }
 0x107   :  { %v332_v60 = vadd.f32 %v2842_v45, %v331_v57  ;;  %v628_v1 = vmax.f32 %v329_v51, 0.0  ;;  %v554_v12 = vadd.f32 %v2216_v7, %v2861_v8  ;;  %v545_v13 = vpop.f32.mrb[17].mxu1 }
 0x108   :  { %v631_v63 = vmax.f32 %v340_v56, 0.0  ;;  %v546_v16 = vadd.f32 %v2861_v8, %v545_v13  ;;  %v2217_v17 = vpop.f32.mrb[18].mxu1 }
 0x109   :  { %v629_v2 = vmax.f32 %v332_v60, 0.0  ;;  %v658_v20 = vmax.f32 %v554_v12, 0.0  ;;  %v557_v21 = vadd.f32 %v2217_v17, %v2861_v8  ;;  %v548_v22 = vpop.f32.mrb[19].mxu1 }
 0x10a   :  { %v683_v4 = vpack.c.bf16 %v631_v63, %v630_v62  ;;  %v656_v25 = vmax.f32 %v546_v16, 0.0  ;;  %v549_v26 = vadd.f32 %v2861_v8, %v548_v22 }
 0x10b   :  { %v682_v10 = vpack.c.bf16 %v629_v2, %v628_v1  ;;  %v2188_v11 = vpop.f32.mrb[24].mxu0  ;;  %v659_v28 = vmax.f32 %v557_v21, 0.0 }
 0x10c   :  { %v353_v14 = vadd.f32 %v2188_v11, %v2842_v45  ;;  %v344_v15 = vpop.f32.mrb[25].mxu0  ;;  %v657_v31 = vmax.f32 %v549_v26, 0.0 }
 0x10d   :  { %v345_v18 = vadd.f32 %v2842_v45, %v344_v15  ;;  %v2189_v19 = vpop.f32.mrb[26].mxu0  ;;  %2266 = vmatprep.mubr.bf16.mxu1 %v682_v10  ;;  %v2934_v34 = vpack.c.bf16 %v659_v28, %v658_v20 }
 0x10e   :  { %v356_v23 = vadd.f32 %v2189_v19, %v2842_v45  ;;  %v347_v24 = vpop.f32.mrb[27].mxu0  ;;  %2267 = vmatmul.mubr.bf16.gmra.mrb[52].mxu1 %v683_v4  ;;  %v634_v29 = vmax.f32 %v353_v14, 0.0  ;;  %v2936_v37 = vpack.c.bf16 %v657_v31, %v656_v25  ;;  %v2220_v40 = vpop.f32.mrb[20].mxu1 }
 0x10f   :  { %v348_v27 = vadd.f32 %v2842_v45, %v347_v24  ;;  %v632_v32 = vmax.f32 %v345_v18, 0.0  ;;  %v570_v44 = vadd.f32 %v2220_v40, %v2861_v8  ;;  %v561_v46 = vpop.f32.mrb[21].mxu1 }
 0x110   :  { %v635_v30 = vmax.f32 %v356_v23, 0.0  ;;  %v562_v49 = vadd.f32 %v2861_v8, %v561_v46  ;;  %v2221_v50 = vpop.f32.mrb[22].mxu1 }
 0x111   :  { %v633_v33 = vmax.f32 %v348_v27, 0.0  ;;  %v662_v53 = vmax.f32 %v570_v44, 0.0  ;;  %v573_v54 = vadd.f32 %v2221_v50, %v2861_v8  ;;  %v564_v55 = vpop.f32.mrb[23].mxu1 }
 0x112   :  { %v685_v35 = vpack.c.bf16 %v635_v30, %v634_v29  ;;  %v660_v58 = vmax.f32 %v562_v49, 0.0  ;;  %v565_v59 = vadd.f32 %v2861_v8, %v564_v55 }
 0x113   :  { %v684_v42 = vpack.c.bf16 %v633_v33, %v632_v32  ;;  %v2192_v43 = vpop.f32.mrb[28].mxu0  ;;  %v663_v61 = vmax.f32 %v573_v54, 0.0 }
 0x114   :  { %v369_v47 = vadd.f32 %v2192_v43, %v2842_v45  ;;  %v360_v48 = vpop.f32.mrb[29].mxu0  ;;  %v661_v0 = vmax.f32 %v565_v59, 0.0 }
 0x115   :  { %v361_v51 = vadd.f32 %v2842_v45, %v360_v48  ;;  %v2193_v52 = vpop.f32.mrb[30].mxu0  ;;  %2270 = vmatprep.mubr.bf16.mxu1 %v684_v42  ;;  %v931_v4 = vpack.c.bf16 %v663_v61, %v662_v53 }
 0x116   :  { %v372_v56 = vadd.f32 %v2193_v52, %v2842_v45  ;;  %v363_v57 = vpop.f32.mrb[31].mxu0  ;;  %2271 = vmatmul.mubr.bf16.gmra.mrb[56].mxu1 %v685_v35  ;;  %v638_v62 = vmax.f32 %v369_v47, 0.0  ;;  %v930_v10 = vpack.c.bf16 %v661_v0, %v660_v58  ;;  %v2224_v11 = vpop.f32.mrb[24].mxu1 }
 0x117   :  { %v364_v60 = vadd.f32 %v2842_v45, %v363_v57  ;;  %v636_v1 = vmax.f32 %v361_v51, 0.0  ;;  %v586_v13 = vadd.f32 %v2224_v11, %v2861_v8  ;;  %v577_v14 = vpop.f32.mrb[25].mxu1 }
 0x118   :  { %v639_v63 = vmax.f32 %v372_v56, 0.0  ;;  %v578_v15 = vadd.f32 %v2861_v8, %v577_v14  ;;  %v2225_v16 = vpop.f32.mrb[26].mxu1 }
 0x119   :  { %v637_v2 = vmax.f32 %v364_v60, 0.0  ;;  %v666_v17 = vmax.f32 %v586_v13, 0.0  ;;  %v589_v45 = vadd.f32 %v2225_v16, %v2861_v8  ;;  %v580_v18 = vpop.f32.mrb[27].mxu1 }
 0x11a   :  { %v687_v7 = vpack.c.bf16 %v639_v63, %v638_v62  ;;  %v664_v19 = vmax.f32 %v578_v15, 0.0  ;;  %v581_v20 = vadd.f32 %v2861_v8, %v580_v18 }
 0x11b   :  { %v686_v12 = vpack.c.bf16 %v637_v2, %v636_v1  ;;  %v667_v21 = vmax.f32 %v589_v45, 0.0 }
 0x11c   :  { %v665_v22 = vmax.f32 %v581_v20, 0.0 }
 0x11d   :  { %2274 = vmatprep.mubr.bf16.mxu1 %v686_v12  ;;  %v933_v23 = vpack.c.bf16 %v667_v21, %v666_v17 }
 0x11e   :  { %2275 = vmatmul.mubr.bf16.gmra.mrb[60].mxu1 %v687_v7  ;;  %v932_v24 = vpack.c.bf16 %v665_v22, %v664_v19  ;;  %v2228_v25 = vpop.f32.mrb[28].mxu1 }
 0x11f   :  { %2294 = vmatprep.mubr.bf16.mxu1 %v2879_v41  ;;  %v602_v26 = vadd.f32 %v2228_v25, %v2861_v8  ;;  %v593_v27 = vpop.f32.mrb[29].mxu1 }
 0x120   :  { %v594_v28 = vadd.f32 %v2861_v8, %v593_v27  ;;  %v2229_v29 = vpop.f32.mrb[30].mxu1 }
 0x121   :  { %v670_v30 = vmax.f32 %v602_v26, 0.0  ;;  %v605_v31 = vadd.f32 %v2229_v29, %v2861_v8  ;;  %v596_v32 = vpop.f32.mrb[31].mxu1 }
 0x122   :  { %v668_v33 = vmax.f32 %v594_v28, 0.0  ;;  %v597_v41 = vadd.f32 %v2861_v8, %v596_v32  ;;  %v2461_v8 = vld [vmem:[%s3237_s11] sm:$0xff]  }
 0x123   :  { %v671_v35 = vmax.f32 %v605_v31, 0.0  ;;  %2326 = vmatprep.subr.bf16.mxu0 %v2461_v8 }
 0x124   :  { %v669_v40 = vmax.f32 %v597_v41, 0.0  ;;  %2327 = vmatpush3.bf16.msra.mxu0 %v2461_v8 }
 0x125   :  { %v935_v42 = vpack.c.bf16 %v671_v35, %v670_v30 }
 0x126   :  { %2295 = vmatmul.mubr.bf16.vlgmr.msra.gmra.mrb[64].mxu1 %v2877_v39  ;;  %v934_v43 = vpack.c.bf16 %v669_v40, %v668_v33  ;;  %v2462_v39 = vld [vmem:[%s3237_s11 + $0x8] sm:$0xff]  }
 0x127   :  { %2298 = vmatprep.mubr.bf16.mxu1 %v2897_v9  ;;  %2328 = vmatprep.subr.bf16.mxu0 %v2462_v39  ;;  %v2464_v9 = vld [vmem:[%s3237_s11 + $0x18] sm:$0xff]  }
 0x128   :  { %2329 = vmatpush3.bf16.msra.mxu0 %v2462_v39 }
 0x12e   :  { %2299 = vmatmul.mubr.bf16.gmra.mrb[68].mxu1 %v2895_v6  ;;  %v2463_v6 = vld [vmem:[%s3237_s11 + $0x10] sm:$0xff]  }
 0x12f   :  { %2302 = vmatprep.mubr.bf16.mxu1 %v2912_v38  ;;  %2330 = vmatprep.subr.bf16.mxu0 %v2463_v6  ;;  %v2985_v38 = vld [vmem:[%s3233_s7] ss:$0 sm:$0xff] }
 0x130   :  { %2331 = vmatpush3.bf16.msra.mxu0 %v2463_v6 }
 0x131   :  { %2332 = vmatprep.subr.bf16.mxu0 %v2464_v9 }
 0x134   :  { %2333 = vmatpush3.bf16.msra.mxu0 %v2464_v9 }
 0x136   :  { %2303 = vmatmul.mubr.bf16.gmra.mrb[72].mxu1 %v2910_v36  ;;  %v2979_v36 = vld [vmem:[%s3236_s10] sm:$0xff]  }
 0x137   :  { %2306 = vmatprep.mubr.bf16.mxu1 %v2924_v5  ;;  %2366 = vmatprep.subr.bf16.mxu0 %v2979_v36 }
 0x13e   :  { %2307 = vmatmul.mubr.bf16.gmra.mrb[76].mxu1 %v2922_v3 }
 0x13f   :  { %2310 = vmatprep.mubr.bf16.mxu1 %v2936_v37 }
 0x146   :  { %2311 = vmatmul.mubr.bf16.gmra.mrb[80].mxu1 %v2934_v34 }
 0x147   :  { %2314 = vmatprep.mubr.bf16.mxu1 %v930_v10 }
 0x14e   :  { %2315 = vmatmul.mubr.bf16.gmra.mrb[84].mxu1 %v931_v4 }
 0x14f   :  { %2318 = vmatprep.mubr.bf16.mxu1 %v932_v24 }
 0x156   :  { %2319 = vmatmul.mubr.bf16.gmra.mrb[88].mxu1 %v933_v23 }
 0x157   :  { %2322 = vmatprep.mubr.bf16.mxu1 %v934_v43 }
 0x15e   :  { %2323 = vmatmul.mubr.bf16.gmra.mrb[92].mxu1 %v935_v42 }
 0x1b9   :  { %v2248_v3 = vpop.f32.mrb[32].mxu1 }
 0x1ba   :  { %v802_v5 = vadd.f32 %v2248_v3, %v2985_v38  ;;  %v793_v34 = vpop.f32.mrb[33].mxu1 }
 0x1bb   :  { %v794_v37 = vadd.f32 %v2985_v38, %v793_v34  ;;  %v2249_v44 = vpop.f32.mrb[34].mxu1 }
 0x1bc   :  { %v805_v46 = vadd.f32 %v2249_v44, %v2985_v38  ;;  %v796_v47 = vpop.f32.mrb[35].mxu1  ;;  %v1170_v49 = vmax.f32 %v802_v5, 0.0 }
 0x1bd   :  { %v797_v48 = vadd.f32 %v2985_v38, %v796_v47  ;;  %v1168_v51 = vmax.f32 %v794_v37, 0.0 }
 0x1be   :  { %v1171_v50 = vmax.f32 %v805_v46, 0.0 }
 0x1bf   :  { %v1169_v52 = vmax.f32 %v797_v48, 0.0 }
 0x1c0   :  { %v2991_v53 = vpack.c.bf16 %v1171_v50, %v1170_v49 }
 0x1c1   :  { %v2993_v54 = vpack.c.bf16 %v1169_v52, %v1168_v51  ;;  %v2252_v55 = vpop.f32.mrb[36].mxu1 }
 0x1c2   :  { %v818_v56 = vadd.f32 %v2252_v55, %v2985_v38  ;;  %v809_v57 = vpop.f32.mrb[37].mxu1 }
 0x1c3   :  { %v810_v58 = vadd.f32 %v2985_v38, %v809_v57  ;;  %v2253_v59 = vpop.f32.mrb[38].mxu1 }
 0x1c4   :  { %v821_v60 = vadd.f32 %v2253_v59, %v2985_v38  ;;  %v812_v61 = vpop.f32.mrb[39].mxu1  ;;  %v1174_v63 = vmax.f32 %v818_v56, 0.0 }
 0x1c5   :  { %v813_v62 = vadd.f32 %v2985_v38, %v812_v61  ;;  %v1172_v1 = vmax.f32 %v810_v58, 0.0 }
 0x1c6   :  { %v1175_v0 = vmax.f32 %v821_v60, 0.0 }
 0x1c7   :  { %v1173_v2 = vmax.f32 %v813_v62, 0.0 }
 0x1c8   :  { %v2999_v4 = vpack.c.bf16 %v1175_v0, %v1174_v63 }
 0x1c9   :  { %v3001_v7 = vpack.c.bf16 %v1173_v2, %v1172_v1  ;;  %v2256_v10 = vpop.f32.mrb[40].mxu1 }
 0x1ca   :  { %v834_v11 = vadd.f32 %v2256_v10, %v2985_v38  ;;  %v825_v12 = vpop.f32.mrb[41].mxu1 }
 0x1cb   :  { %v826_v13 = vadd.f32 %v2985_v38, %v825_v12  ;;  %v2257_v14 = vpop.f32.mrb[42].mxu1 }
 0x1cc   :  { %v837_v15 = vadd.f32 %v2257_v14, %v2985_v38  ;;  %v828_v16 = vpop.f32.mrb[43].mxu1  ;;  %v1178_v45 = vmax.f32 %v834_v11, 0.0 }
 0x1cd   :  { %v829_v17 = vadd.f32 %v2985_v38, %v828_v16  ;;  %v1176_v19 = vmax.f32 %v826_v13, 0.0 }
 0x1ce   :  { %v1179_v18 = vmax.f32 %v837_v15, 0.0 }
 0x1cf   :  { %v1177_v20 = vmax.f32 %v829_v17, 0.0 }
 0x1d0   :  { %v3007_v21 = vpack.c.bf16 %v1179_v18, %v1178_v45 }
 0x1d1   :  { %v3009_v22 = vpack.c.bf16 %v1177_v20, %v1176_v19  ;;  %v2260_v23 = vpop.f32.mrb[44].mxu1 }
 0x1d2   :  { %v850_v24 = vadd.f32 %v2260_v23, %v2985_v38  ;;  %v841_v25 = vpop.f32.mrb[45].mxu1 }
 0x1d3   :  { %v842_v26 = vadd.f32 %v2985_v38, %v841_v25  ;;  %v2261_v27 = vpop.f32.mrb[46].mxu1 }
 0x1d4   :  { %v853_v28 = vadd.f32 %v2261_v27, %v2985_v38  ;;  %v844_v29 = vpop.f32.mrb[47].mxu1  ;;  %v1182_v31 = vmax.f32 %v850_v24, 0.0 }
 0x1d5   :  { %v845_v30 = vadd.f32 %v2985_v38, %v844_v29  ;;  %v1180_v33 = vmax.f32 %v842_v26, 0.0 }
 0x1d6   :  { %v1183_v32 = vmax.f32 %v853_v28, 0.0 }
 0x1d7   :  { %v1181_v41 = vmax.f32 %v845_v30, 0.0 }
 0x1d8   :  { %v3015_v35 = vpack.c.bf16 %v1183_v32, %v1182_v31 }
 0x1d9   :  { %v3017_v40 = vpack.c.bf16 %v1181_v41, %v1180_v33  ;;  %v2264_v42 = vpop.f32.mrb[48].mxu1 }
 0x1da   :  { %v866_v43 = vadd.f32 %v2264_v42, %v2985_v38  ;;  %v857_v8 = vpop.f32.mrb[49].mxu1  ;;  %v3050_v42 = vld [vmem:[%s3235_s9] ss:$0 sm:$0xff] }
 0x1db   :  { %v858_v39 = vadd.f32 %v2985_v38, %v857_v8  ;;  %v2265_v6 = vpop.f32.mrb[50].mxu1 }
 0x1dc   :  { %v869_v9 = vadd.f32 %v2265_v6, %v2985_v38  ;;  %v860_v3 = vpop.f32.mrb[51].mxu1  ;;  %v1186_v34 = vmax.f32 %v866_v43, 0.0 }
 0x1dd   :  { %v861_v5 = vadd.f32 %v2985_v38, %v860_v3  ;;  %v1184_v44 = vmax.f32 %v858_v39, 0.0 }
 0x1de   :  { %v1187_v37 = vmax.f32 %v869_v9, 0.0 }
 0x1df   :  { %v1185_v46 = vmax.f32 %v861_v5, 0.0 }
 0x1e0   :  { %v3023_v47 = vpack.c.bf16 %v1187_v37, %v1186_v34 }
 0x1e1   :  { %v3025_v48 = vpack.c.bf16 %v1185_v46, %v1184_v44  ;;  %v2268_v49 = vpop.f32.mrb[52].mxu1 }
 0x1e2   :  { %v882_v50 = vadd.f32 %v2268_v49, %v2985_v38  ;;  %v873_v51 = vpop.f32.mrb[53].mxu1 }
 0x1e3   :  { %v874_v52 = vadd.f32 %v2985_v38, %v873_v51  ;;  %v2269_v55 = vpop.f32.mrb[54].mxu1 }
 0x1e4   :  { %v885_v56 = vadd.f32 %v2269_v55, %v2985_v38  ;;  %v876_v57 = vpop.f32.mrb[55].mxu1  ;;  %v1190_v59 = vmax.f32 %v882_v50, 0.0 }
 0x1e5   :  { %v877_v58 = vadd.f32 %v2985_v38, %v876_v57  ;;  %v1188_v61 = vmax.f32 %v874_v52, 0.0 }
 0x1e6   :  { %v1191_v60 = vmax.f32 %v885_v56, 0.0 }
 0x1e7   :  { %v1189_v62 = vmax.f32 %v877_v58, 0.0  ;;  %v2466_v58 = vld [vmem:[%s3236_s10 + $0x8] sm:$0xff]  }
 0x1e8   :  { %v3031_v63 = vpack.c.bf16 %v1191_v60, %v1190_v59 }
 0x1e9   :  { %v3033_v0 = vpack.c.bf16 %v1189_v62, %v1188_v61  ;;  %v2272_v1 = vpop.f32.mrb[56].mxu1 }
 0x1ea   :  { %v898_v2 = vadd.f32 %v2272_v1, %v2985_v38  ;;  %v889_v10 = vpop.f32.mrb[57].mxu1 }
 0x1eb   :  { %v890_v11 = vadd.f32 %v2985_v38, %v889_v10  ;;  %v2273_v12 = vpop.f32.mrb[58].mxu1 }
 0x1ec   :  { %v901_v13 = vadd.f32 %v2273_v12, %v2985_v38  ;;  %v892_v14 = vpop.f32.mrb[59].mxu1  ;;  %v1194_v16 = vmax.f32 %v898_v2, 0.0 }
 0x1ed   :  { %v893_v15 = vadd.f32 %v2985_v38, %v892_v14  ;;  %v1192_v45 = vmax.f32 %v890_v11, 0.0  ;;  %v2467_v11 = vld [vmem:[%s3236_s10 + $0x10] sm:$0xff]  }
 0x1ee   :  { %v1195_v17 = vmax.f32 %v901_v13, 0.0 }
 0x1ef   :  { %v1193_v18 = vmax.f32 %v893_v15, 0.0 }
 0x1f0   :  { %v3039_v19 = vpack.c.bf16 %v1195_v17, %v1194_v16 }
 0x1f1   :  { %v3041_v20 = vpack.c.bf16 %v1193_v18, %v1192_v45  ;;  %v2276_v23 = vpop.f32.mrb[60].mxu1 }
 0x1f2   :  { %v914_v24 = vadd.f32 %v2276_v23, %v2985_v38  ;;  %v905_v25 = vpop.f32.mrb[61].mxu1 }
 0x1f3   :  { %v906_v26 = vadd.f32 %v2985_v38, %v905_v25  ;;  %v2277_v27 = vpop.f32.mrb[62].mxu1 }
 0x1f4   :  { %v917_v28 = vadd.f32 %v2277_v27, %v2985_v38  ;;  %v908_v29 = vpop.f32.mrb[63].mxu1  ;;  %v1198_v31 = vmax.f32 %v914_v24, 0.0 }
 0x1f5   :  { %v909_v30 = vadd.f32 %v2985_v38, %v908_v29  ;;  %v1196_v33 = vmax.f32 %v906_v26, 0.0 }
 0x1f6   :  { %v1199_v32 = vmax.f32 %v917_v28, 0.0 }
 0x1f7   :  { %v1197_v41 = vmax.f32 %v909_v30, 0.0 }
 0x1f8   :  { %v3052_v43 = vpack.c.bf16 %v1199_v32, %v1198_v31 }
 0x1f9   :  { %v3054_v8 = vpack.c.bf16 %v1197_v41, %v1196_v33  ;;  %v2296_v39 = vpop.f32.mrb[64].mxu1 }
 0x1fa   :  { %v1050_v6 = vadd.f32 %v2296_v39, %v3050_v42  ;;  %v1041_v9 = vpop.f32.mrb[65].mxu1 }
 0x1fb   :  { %v1042_v3 = vadd.f32 %v3050_v42, %v1041_v9  ;;  %v2297_v38 = vpop.f32.mrb[66].mxu1 }
 0x1fc   :  { %v1053_v5 = vadd.f32 %v2297_v38, %v3050_v42  ;;  %v1044_v34 = vpop.f32.mrb[67].mxu1  ;;  %v1218_v44 = vmax.f32 %v1050_v6, 0.0 }
 0x1fd   :  { %v1045_v37 = vadd.f32 %v3050_v42, %v1044_v34  ;;  %v1216_v49 = vmax.f32 %v1042_v3, 0.0 }
 0x1fe   :  { %v1219_v46 = vmax.f32 %v1053_v5, 0.0 }
 0x1ff   :  { %v1217_v50 = vmax.f32 %v1045_v37, 0.0 }
 0x200   :  { %v1249_v51 = vpack.c.bf16 %v1219_v46, %v1218_v44 }
 0x201   :  { %v1248_v52 = vpack.c.bf16 %v1217_v50, %v1216_v49  ;;  %v2300_v55 = vpop.f32.mrb[68].mxu1 }
 0x202   :  { %v1066_v56 = vadd.f32 %v2300_v55, %v3050_v42  ;;  %v1057_v57 = vpop.f32.mrb[69].mxu1 }
 0x203   :  { %v1058_v59 = vadd.f32 %v3050_v42, %v1057_v57  ;;  %v2301_v60 = vpop.f32.mrb[70].mxu1  ;;  %2334 = vmatprep.mubr.msk.bf16.mxu0 %vm1304_vm2, %v1248_v52 }
 0x204   :  { %v1069_v61 = vadd.f32 %v2301_v60, %v3050_v42  ;;  %v1060_v62 = vpop.f32.mrb[71].mxu1  ;;  %2335 = vmatmul.mubr.msk.bf16.vlgmr.msra.gmra.mrb[32].mxu0 %vm1304_vm2, %v1249_v51  ;;  %v1222_v2 = vmax.f32 %v1066_v56, 0.0 }
 0x205   :  { %v1061_v1 = vadd.f32 %v3050_v42, %v1060_v62  ;;  %2367 = vmatpush3.bf16.msra.mxu0 %v2979_v36  ;;  %v1220_v12 = vmax.f32 %v1058_v59, 0.0  ;;  %v2468_v36 = vld [vmem:[%s3236_s10 + $0x18] sm:$0xff]  }
 0x206   :  { %v1223_v10 = vmax.f32 %v1069_v61, 0.0  ;;  %2368 = vmatprep.subr.bf16.mxu0 %v2466_v58 }
 0x207   :  { %v1221_v13 = vmax.f32 %v1061_v1, 0.0 }
 0x208   :  { %v1251_v14 = vpack.c.bf16 %v1223_v10, %v1222_v2 }
 0x209   :  { %v1250_v15 = vpack.c.bf16 %v1221_v13, %v1220_v12  ;;  %v2304_v16 = vpop.f32.mrb[72].mxu1  ;;  %2369 = vmatpush3.bf16.msra.mxu0 %v2466_v58 }
 0x20a   :  { %v1082_v17 = vadd.f32 %v2304_v16, %v3050_v42  ;;  %v1073_v45 = vpop.f32.mrb[73].mxu1  ;;  %2370 = vmatprep.subr.bf16.mxu0 %v2467_v11 }
 0x20b   :  { %v1074_v18 = vadd.f32 %v3050_v42, %v1073_v45  ;;  %v2305_v23 = vpop.f32.mrb[74].mxu1  ;;  %2338 = vmatprep.mubr.msk.bf16.mxu0 %vm1304_vm2, %v1250_v15 }
 0x20c   :  { %v1085_v24 = vadd.f32 %v2305_v23, %v3050_v42  ;;  %v1076_v25 = vpop.f32.mrb[75].mxu1  ;;  %2339 = vmatmul.mubr.msk.bf16.gmra.mrb[36].mxu0 %vm1304_vm2, %v1251_v14  ;;  %v1226_v27 = vmax.f32 %v1082_v17, 0.0 }
 0x20d   :  { %v1077_v26 = vadd.f32 %v3050_v42, %v1076_v25  ;;  %2371 = vmatpush3.bf16.msra.mxu0 %v2467_v11  ;;  %v1224_v29 = vmax.f32 %v1074_v18, 0.0 }
 0x20e   :  { %v1227_v28 = vmax.f32 %v1085_v24, 0.0  ;;  %2372 = vmatprep.subr.bf16.mxu0 %v2468_v36 }
 0x20f   :  { %v1225_v30 = vmax.f32 %v1077_v26, 0.0 }
 0x210   :  { %v1253_v31 = vpack.c.bf16 %v1227_v28, %v1226_v27 }
 0x211   :  { %v1252_v32 = vpack.c.bf16 %v1225_v30, %v1224_v29  ;;  %v2308_v33 = vpop.f32.mrb[76].mxu1  ;;  %2373 = vmatpush3.bf16.msra.mxu0 %v2468_v36 }
 0x212   :  { %v1098_v41 = vadd.f32 %v2308_v33, %v3050_v42  ;;  %v1089_v39 = vpop.f32.mrb[77].mxu1 }
 0x213   :  { %v1090_v6 = vadd.f32 %v3050_v42, %v1089_v39  ;;  %v2309_v9 = vpop.f32.mrb[78].mxu1  ;;  %2342 = vmatprep.mubr.msk.bf16.mxu0 %vm1304_vm2, %v1252_v32 }
 0x214   :  { %v1101_v3 = vadd.f32 %v2309_v9, %v3050_v42  ;;  %v1092_v38 = vpop.f32.mrb[79].mxu1  ;;  %2343 = vmatmul.mubr.msk.bf16.gmra.mrb[40].mxu0 %vm1304_vm2, %v1253_v31  ;;  %v1230_v34 = vmax.f32 %v1098_v41, 0.0 }
 0x215   :  { %v1093_v5 = vadd.f32 %v3050_v42, %v1092_v38  ;;  %v1228_v44 = vmax.f32 %v1090_v6, 0.0 }
 0x216   :  { %v1231_v37 = vmax.f32 %v1101_v3, 0.0 }
 0x217   :  { %v1229_v46 = vmax.f32 %v1093_v5, 0.0 }
 0x218   :  { %v1255_v49 = vpack.c.bf16 %v1231_v37, %v1230_v34 }
 0x219   :  { %v1254_v50 = vpack.c.bf16 %v1229_v46, %v1228_v44  ;;  %v2312_v51 = vpop.f32.mrb[80].mxu1 }
 0x21a   :  { %v1114_v52 = vadd.f32 %v2312_v51, %v3050_v42  ;;  %v1105_v55 = vpop.f32.mrb[81].mxu1 }
 0x21b   :  { %v1106_v56 = vadd.f32 %v3050_v42, %v1105_v55  ;;  %v2313_v57 = vpop.f32.mrb[82].mxu1  ;;  %2346 = vmatprep.mubr.msk.bf16.mxu0 %vm1304_vm2, %v1254_v50 }
 0x21c   :  { %v1117_v58 = vadd.f32 %v2313_v57, %v3050_v42  ;;  %v1108_v59 = vpop.f32.mrb[83].mxu1  ;;  %2347 = vmatmul.mubr.msk.bf16.gmra.mrb[44].mxu0 %vm1304_vm2, %v1255_v49  ;;  %v1234_v61 = vmax.f32 %v1114_v52, 0.0 }
 0x21d   :  { %v1109_v60 = vadd.f32 %v3050_v42, %v1108_v59  ;;  %v1232_v1 = vmax.f32 %v1106_v56, 0.0 }
 0x21e   :  { %v1235_v62 = vmax.f32 %v1117_v58, 0.0 }
 0x21f   :  { %v1233_v2 = vmax.f32 %v1109_v60, 0.0 }
 0x220   :  { %v1257_v10 = vpack.c.bf16 %v1235_v62, %v1234_v61 }
 0x221   :  { %v1256_v11 = vpack.c.bf16 %v1233_v2, %v1232_v1  ;;  %v2316_v12 = vpop.f32.mrb[84].mxu1 }
 0x222   :  { %v1130_v13 = vadd.f32 %v2316_v12, %v3050_v42  ;;  %v1121_v14 = vpop.f32.mrb[85].mxu1 }
 0x223   :  { %v1122_v15 = vadd.f32 %v3050_v42, %v1121_v14  ;;  %v2317_v16 = vpop.f32.mrb[86].mxu1  ;;  %2350 = vmatprep.mubr.msk.bf16.mxu0 %vm1304_vm2, %v1256_v11 }
 0x224   :  { %v1133_v17 = vadd.f32 %v2317_v16, %v3050_v42  ;;  %v1124_v45 = vpop.f32.mrb[87].mxu1  ;;  %2351 = vmatmul.mubr.msk.bf16.gmra.mrb[48].mxu0 %vm1304_vm2, %v1257_v10  ;;  %v1238_v18 = vmax.f32 %v1130_v13, 0.0 }
 0x225   :  { %v1125_v36 = vadd.f32 %v3050_v42, %v1124_v45  ;;  %v1236_v24 = vmax.f32 %v1122_v15, 0.0 }
 0x226   :  { %v1239_v23 = vmax.f32 %v1133_v17, 0.0 }
 0x227   :  { %v1237_v25 = vmax.f32 %v1125_v36, 0.0 }
 0x228   :  { %v1259_v26 = vpack.c.bf16 %v1239_v23, %v1238_v18 }
 0x229   :  { %v1258_v27 = vpack.c.bf16 %v1237_v25, %v1236_v24  ;;  %v2320_v28 = vpop.f32.mrb[88].mxu1 }
 0x22a   :  { %v1146_v29 = vadd.f32 %v2320_v28, %v3050_v42  ;;  %v1137_v30 = vpop.f32.mrb[89].mxu1 }
 0x22b   :  { %v1138_v31 = vadd.f32 %v3050_v42, %v1137_v30  ;;  %v2321_v32 = vpop.f32.mrb[90].mxu1  ;;  %2354 = vmatprep.mubr.msk.bf16.mxu0 %vm1304_vm2, %v1258_v27 }
 0x22c   :  { %v1149_v33 = vadd.f32 %v2321_v32, %v3050_v42  ;;  %v1140_v41 = vpop.f32.mrb[91].mxu1  ;;  %2355 = vmatmul.mubr.msk.bf16.gmra.mrb[52].mxu0 %vm1304_vm2, %v1259_v26  ;;  %v1242_v6 = vmax.f32 %v1146_v29, 0.0 }
 0x22d   :  { %v1141_v39 = vadd.f32 %v3050_v42, %v1140_v41  ;;  %v1240_v3 = vmax.f32 %v1138_v31, 0.0 }
 0x22e   :  { %v1243_v9 = vmax.f32 %v1149_v33, 0.0 }
 0x22f   :  { %v1241_v38 = vmax.f32 %v1141_v39, 0.0 }
 0x230   :  { %v1261_v5 = vpack.c.bf16 %v1243_v9, %v1242_v6 }
 0x231   :  { %v1260_v34 = vpack.c.bf16 %v1241_v38, %v1240_v3  ;;  %v2324_v37 = vpop.f32.mrb[92].mxu1 }
 0x232   :  { %v1162_v44 = vadd.f32 %v2324_v37, %v3050_v42  ;;  %v1153_v46 = vpop.f32.mrb[93].mxu1 }
 0x233   :  { %v1154_v49 = vadd.f32 %v3050_v42, %v1153_v46  ;;  %v2325_v50 = vpop.f32.mrb[94].mxu1  ;;  %2358 = vmatprep.mubr.msk.bf16.mxu0 %vm1304_vm2, %v1260_v34 }
 0x234   :  { %v1165_v51 = vadd.f32 %v2325_v50, %v3050_v42  ;;  %v1156_v52 = vpop.f32.mrb[95].mxu1  ;;  %2359 = vmatmul.mubr.msk.bf16.gmra.mrb[56].mxu0 %vm1304_vm2, %v1261_v5  ;;  %v1246_v56 = vmax.f32 %v1162_v44, 0.0 }
 0x235   :  { %v1157_v55 = vadd.f32 %v3050_v42, %v1156_v52  ;;  %v1244_v58 = vmax.f32 %v1154_v49, 0.0 }
 0x236   :  { %v1247_v57 = vmax.f32 %v1165_v51, 0.0 }
 0x237   :  { %v1245_v59 = vmax.f32 %v1157_v55, 0.0 }
 0x238   :  { %v1263_v60 = vpack.c.bf16 %v1247_v57, %v1246_v56 }
 0x239   :  { %v1262_v61 = vpack.c.bf16 %v1245_v59, %v1244_v58 }
 0x23b   :  { %2362 = vmatprep.mubr.msk.bf16.mxu0 %vm1304_vm2, %v1262_v61 }
 0x23c   :  { %2363 = vmatmul.mubr.msk.bf16.gmra.mrb[60].mxu0 %vm1304_vm2, %v1263_v60 }
 0x23d   :  { %2374 = vmatprep.mubr.msk.bf16.mxu0 %vm1304_vm2, %v2993_v54  ;;  %v1835_v54 = vld [vmem:[#allocation2] sm:$0x1] }
 0x244   :  { %2375 = vmatmul.mubr.msk.bf16.vlgmr.msra.gmra.mrb[32].mxu0 %vm1304_vm2, %v2991_v53  ;;  %v3149_v53 = vld [vmem:[%s3239_s13] sm:$0x1] }
 0x245   :  { %2378 = vmatprep.mubr.msk.bf16.mxu0 %vm1304_vm2, %v3001_v7  ;;  %v3155_v7 = vld [vmem:[%s3238_s12] ss:$0 sm:$0xff]  ;;  %s2495_s12 = smov [#allocation3]  }
 0x246   :  { %s1915_s13 = sshll.u32 %s2495_s12, 4  ;;  %s1916_s13 = int_to_ptr.vmem [resolvable:$true] %s1915_s13 }
 0x247   :  { %s2469_s20 = scalar_lea.vmem %s1916_s13, 32  ;;  %p2474_p1 = scmp.lt.s32.totalorder %s1916_s13, %s1916_s13 }
 0x248   :  { %p2470_p0 = scmp.ne.s32.totalorder %s1916_s13, %s2469_s20  ;;  %p2475_p2 = scmp.lt.s32.totalorder %s2469_s20, %s2469_s20 }
 0x24a   :  { %p2476_p3 = por %p2475_p2, %p2474_p1 }
 0x24c   :  { %2379 = vmatmul.mubr.msk.bf16.gmra.mrb[36].mxu0 %vm1304_vm2, %v2999_v4  ;;  %v2493_v4 = vmov 0   ;;  %p2477_p4 = pnand %p2476_p3, %p2470_p0 }
 0x24d   :  { %2382 = vmatprep.mubr.msk.bf16.mxu0 %vm1304_vm2, %v3009_v22  ;;  %2441 = vset.pattern.permute.xlu0 %v2493_v4 }
 0x24e   :  { %1838 = vperm.xlu0 %2441, %v1835_v54  }
 0x254   :  { %2383 = vmatmul.mubr.msk.bf16.gmra.mrb[40].mxu0 %vm1304_vm2, %v3007_v21 }
 0x255   :  { %2386 = vmatprep.mubr.msk.bf16.mxu0 %vm1304_vm2, %v3017_v40 }
 0x25c   :  { %2387 = vmatmul.mubr.msk.bf16.gmra.mrb[44].mxu0 %vm1304_vm2, %v3015_v35 }
 0x25d   :  { %2390 = vmatprep.mubr.msk.bf16.mxu0 %vm1304_vm2, %v3025_v48 }
 0x264   :  { %2391 = vmatmul.mubr.msk.bf16.gmra.mrb[48].mxu0 %vm1304_vm2, %v3023_v47 }
 0x265   :  { %2394 = vmatprep.mubr.msk.bf16.mxu0 %vm1304_vm2, %v3033_v0 }
 0x26c   :  { %2395 = vmatmul.mubr.msk.bf16.gmra.mrb[52].mxu0 %vm1304_vm2, %v3031_v63 }
 0x26d   :  { %2398 = vmatprep.mubr.msk.bf16.mxu0 %vm1304_vm2, %v3041_v20 }
 0x274   :  { %2399 = vmatmul.mubr.msk.bf16.gmra.mrb[56].mxu0 %vm1304_vm2, %v3039_v19 }
 0x275   :  { %2402 = vmatprep.mubr.msk.bf16.mxu0 %vm1304_vm2, %v3054_v8 }
 0x27c   :  { %2403 = vmatmul.mubr.msk.bf16.gmra.mrb[60].mxu0 %vm1304_vm2, %v3052_v43 }
 0x27d   :  { %2158 = vmatprep.mubr.bf16.mxu0 %v3149_v53 }
 0x317   :  { %v2376_v21 = vpop.f32.mrb[32].mxu0 }
 0x318   :  { %v1756_v22 = vadd.f32 %v2376_v21, %v3155_v7  ;;  %v1620_v35 = vpop.f32.mrb[33].mxu0 }
 0x319   :  { %v1754_v40 = vadd.f32 %v3155_v7, %v1620_v35  ;;  %v2377_v47 = vpop.f32.mrb[34].mxu0 }
 0x31a   :  { %v1757_v48 = vadd.f32 %v2377_v47, %v3155_v7  ;;  %v1623_v63 = vpop.f32.mrb[35].mxu0  ;;  %v1788_v19 = vmax.f32 %v1756_v22, 0.0 }
 0x31b   :  { %v1755_v0 = vadd.f32 %v3155_v7, %v1623_v63  ;;  %v1786_v42 = vmax.f32 %v1754_v40, 0.0 }
 0x31c   :  { %v1789_v20 = vmax.f32 %v1757_v48, 0.0 }
 0x31d   :  { %v1787_v43 = vmax.f32 %v1755_v0, 0.0 }
 0x31e   :  { %v3161_v8 = vpack.c.bf16 %v1789_v20, %v1788_v19 }
 0x31f   :  { %v3163_v62 = vpack.c.bf16 %v1787_v43, %v1786_v42  ;;  %v2380_v1 = vpop.f32.mrb[36].mxu0 }
 0x320   :  { %v1760_v2 = vadd.f32 %v2380_v1, %v3155_v7  ;;  %v1636_v10 = vpop.f32.mrb[37].mxu0 }
 0x321   :  { %v1758_v11 = vadd.f32 %v3155_v7, %v1636_v10  ;;  %v2381_v12 = vpop.f32.mrb[38].mxu0 }
 0x322   :  { %v1761_v13 = vadd.f32 %v2381_v12, %v3155_v7  ;;  %v1639_v14 = vpop.f32.mrb[39].mxu0  ;;  %v1792_v16 = vmax.f32 %v1760_v2, 0.0 }
 0x323   :  { %v1759_v15 = vadd.f32 %v3155_v7, %v1639_v14  ;;  %v1790_v45 = vmax.f32 %v1758_v11, 0.0 }
 0x324   :  { %v1793_v17 = vmax.f32 %v1761_v13, 0.0 }
 0x325   :  { %v1791_v36 = vmax.f32 %v1759_v15, 0.0 }
 0x326   :  { %v3169_v18 = vpack.c.bf16 %v1793_v17, %v1792_v16 }
 0x327   :  { %v3171_v23 = vpack.c.bf16 %v1791_v36, %v1790_v45  ;;  %v2384_v24 = vpop.f32.mrb[40].mxu0 }
 0x328   :  { %v1764_v25 = vadd.f32 %v2384_v24, %v3155_v7  ;;  %v1652_v26 = vpop.f32.mrb[41].mxu0 }
 0x329   :  { %v1762_v27 = vadd.f32 %v3155_v7, %v1652_v26  ;;  %v2385_v28 = vpop.f32.mrb[42].mxu0 }
 0x32a   :  { %v1765_v29 = vadd.f32 %v2385_v28, %v3155_v7  ;;  %v1655_v30 = vpop.f32.mrb[43].mxu0  ;;  %v1796_v32 = vmax.f32 %v1764_v25, 0.0 }
 0x32b   :  { %v1763_v31 = vadd.f32 %v3155_v7, %v1655_v30  ;;  %v1794_v41 = vmax.f32 %v1762_v27, 0.0 }
 0x32c   :  { %v1797_v33 = vmax.f32 %v1765_v29, 0.0 }
 0x32d   :  { %v1795_v39 = vmax.f32 %v1763_v31, 0.0 }
 0x32e   :  { %v3177_v6 = vpack.c.bf16 %v1797_v33, %v1796_v32 }
 0x32f   :  { %v3179_v9 = vpack.c.bf16 %v1795_v39, %v1794_v41  ;;  %v2388_v3 = vpop.f32.mrb[44].mxu0 }
 0x330   :  { %v1768_v38 = vadd.f32 %v2388_v3, %v3155_v7  ;;  %v1668_v5 = vpop.f32.mrb[45].mxu0 }
 0x331   :  { %v1766_v34 = vadd.f32 %v3155_v7, %v1668_v5  ;;  %v2389_v37 = vpop.f32.mrb[46].mxu0 }
 0x332   :  { %v1769_v44 = vadd.f32 %v2389_v37, %v3155_v7  ;;  %v1671_v46 = vpop.f32.mrb[47].mxu0  ;;  %v1800_v50 = vmax.f32 %v1768_v38, 0.0 }
 0x333   :  { %v1767_v49 = vadd.f32 %v3155_v7, %v1671_v46  ;;  %v1798_v52 = vmax.f32 %v1766_v34, 0.0 }
 0x334   :  { %v1801_v51 = vmax.f32 %v1769_v44, 0.0 }
 0x335   :  { %v1799_v55 = vmax.f32 %v1767_v49, 0.0 }
 0x336   :  { %v3185_v56 = vpack.c.bf16 %v1801_v51, %v1800_v50 }
 0x337   :  { %v3187_v57 = vpack.c.bf16 %v1799_v55, %v1798_v52  ;;  %v2392_v58 = vpop.f32.mrb[48].mxu0 }
 0x338   :  { %v1772_v59 = vadd.f32 %v2392_v58, %v3155_v7  ;;  %v1684_v60 = vpop.f32.mrb[49].mxu0 }
 0x339   :  { %v1770_v61 = vadd.f32 %v3155_v7, %v1684_v60  ;;  %v2393_v54 = vpop.f32.mrb[50].mxu0  ;;  %v2494_v60 = vmov 1966171168  }
 0x33a   :  { %v1773_v4 = vadd.f32 %v2393_v54, %v3155_v7  ;;  %v1687_v21 = vpop.f32.mrb[51].mxu0  ;;  %v1804_v35 = vmax.f32 %v1772_v59, 0.0  ;;  %v1839_v59 = vpop.permute.xlu0 %1838 }
 0x33b   :  { %v1771_v22 = vadd.f32 %v3155_v7, %v1687_v21  ;;  %v1802_v47 = vmax.f32 %v1770_v61, 0.0 }
 0x33c   :  { %v1805_v40 = vmax.f32 %v1773_v4, 0.0 }
 0x33d   :  { %v1803_v48 = vmax.f32 %v1771_v22, 0.0 }
 0x33e   :  { %v1827_v63 = vpack.c.bf16 %v1805_v40, %v1804_v35 }
 0x33f   :  { %v1826_v0 = vpack.c.bf16 %v1803_v48, %v1802_v47  ;;  %v2396_v19 = vpop.f32.mrb[52].mxu0 }
 0x340   :  { %v1776_v20 = vadd.f32 %v2396_v19, %v3155_v7  ;;  %v1700_v42 = vpop.f32.mrb[53].mxu0 }
 0x341   :  { %v1774_v43 = vadd.f32 %v3155_v7, %v1700_v42  ;;  %v2397_v1 = vpop.f32.mrb[54].mxu0  ;;  %2142 = vmatprep.subr.bf16.mxu0 %v1826_v0 }
 0x342   :  { %v1777_v2 = vadd.f32 %v2397_v1, %v3155_v7  ;;  %v1703_v10 = vpop.f32.mrb[55].mxu0  ;;  %2143 = vmatpush3.bf16.xpose.msra.mxu0 %v3163_v62  ;;  %v1808_v12 = vmax.f32 %v1776_v20, 0.0 }
 0x343   :  { %v1775_v11 = vadd.f32 %v3155_v7, %v1703_v10  ;;  %2144 = vmatprep.subr.bf16.mxu0 %v1827_v63  ;;  %v1806_v14 = vmax.f32 %v1774_v43, 0.0 }
 0x344   :  { %v1809_v13 = vmax.f32 %v1777_v2, 0.0 }
 0x345   :  { %v1807_v15 = vmax.f32 %v1775_v11, 0.0 }
 0x346   :  { %v1829_v16 = vpack.c.bf16 %v1809_v13, %v1808_v12 }
 0x347   :  { %v1828_v17 = vpack.c.bf16 %v1807_v15, %v1806_v14  ;;  %v2400_v45 = vpop.f32.mrb[56].mxu0 }
 0x348   :  { %v1780_v36 = vadd.f32 %v2400_v45, %v3155_v7  ;;  %v1716_v24 = vpop.f32.mrb[57].mxu0 }
 0x349   :  { %v1778_v25 = vadd.f32 %v3155_v7, %v1716_v24  ;;  %v2401_v26 = vpop.f32.mrb[58].mxu0 }
 0x34a   :  { %v1781_v27 = vadd.f32 %v2401_v26, %v3155_v7  ;;  %v1719_v28 = vpop.f32.mrb[59].mxu0  ;;  %2145 = vmatpush3.bf16.xpose.msra.mxu0 %v3161_v8  ;;  %v1812_v29 = vmax.f32 %v1780_v36, 0.0 }
 0x34b   :  { %v1779_v62 = vadd.f32 %v3155_v7, %v1719_v28  ;;  %2146 = vmatprep.subr.bf16.mxu0 %v1828_v17  ;;  %v1810_v31 = vmax.f32 %v1778_v25, 0.0 }
 0x34c   :  { %v1813_v30 = vmax.f32 %v1781_v27, 0.0 }
 0x34d   :  { %v1811_v32 = vmax.f32 %v1779_v62, 0.0 }
 0x34e   :  { %v1831_v33 = vpack.c.bf16 %v1813_v30, %v1812_v29 }
 0x34f   :  { %v1830_v41 = vpack.c.bf16 %v1811_v32, %v1810_v31  ;;  %v2404_v39 = vpop.f32.mrb[60].mxu0 }
 0x350   :  { %v1784_v3 = vadd.f32 %v2404_v39, %v3155_v7  ;;  %v1732_v38 = vpop.f32.mrb[61].mxu0 }
 0x351   :  { %v1782_v5 = vadd.f32 %v3155_v7, %v1732_v38  ;;  %v2405_v34 = vpop.f32.mrb[62].mxu0 }
 0x352   :  { %v1785_v37 = vadd.f32 %v2405_v34, %v3155_v7  ;;  %v1735_v44 = vpop.f32.mrb[63].mxu0  ;;  %2147 = vmatpush3.bf16.xpose.msra.mxu0 %v3171_v23  ;;  %v1816_v46 = vmax.f32 %v1784_v3, 0.0 }
 0x353   :  { %v1783_v8 = vadd.f32 %v3155_v7, %v1735_v44  ;;  %2148 = vmatprep.subr.bf16.mxu0 %v1829_v16  ;;  %v1814_v50 = vmax.f32 %v1782_v5, 0.0  ;;  %v1841_v7 = vlaneseq }
 0x354   :  { %v1817_v49 = vmax.f32 %v1785_v37, 0.0 }
 0x355   :  { %v1815_v51 = vmax.f32 %v1783_v8, 0.0  ;;  %v1842_v23 = vshrl.u32 %v1841_v7, 7  ;;  %vm1906_vm3 = vcmp.lt.s32.totalorder %v1841_v7, 256 }
 0x356   :  { %v1833_v52 = vpack.c.bf16 %v1817_v49, %v1816_v46 }
 0x357   :  { %v1832_v55 = vpack.c.bf16 %v1815_v51, %v1814_v50  ;;  %v1843_v58 = vsub.s32 0, %v1842_v23 }
 0x359   :  { %v1844_v61 = vrot.slane %v1839_v59, %v1843_v58 }
 0x35a   :  { %2149 = vmatpush3.bf16.xpose.msra.mxu0 %v3169_v18  ;;  %v1890_v18 = vunpack.c.l.s4 %v2494_v60 }
 0x35b   :  { %2150 = vmatprep.subr.bf16.mxu0 %v1830_v41 }
 0x35c   :  { %v1891_v54 = vunpack.c.0.s8 %v1890_v18 }
 0x35e   :  { %v1894_v22 = vsub.s32 %v1891_v54, %v1842_v23 }
 0x362   :  { %2151 = vmatpush3.bf16.xpose.msra.mxu0 %v3179_v9 }
 0x363   :  { %2152 = vmatprep.subr.bf16.mxu0 %v1831_v33 }
 0x36a   :  { %2153 = vmatpush3.bf16.xpose.msra.mxu0 %v3177_v6 }
 0x36b   :  { %2154 = vmatprep.subr.bf16.mxu0 %v1832_v55 }
 0x372   :  { %2155 = vmatpush3.bf16.xpose.msra.mxu0 %v3187_v57 }
 0x373   :  { %2156 = vmatprep.subr.bf16.mxu0 %v1833_v52 }
 0x37a   :  { %2157 = vmatpush3.bf16.xpose.msra.mxu0 %v3185_v56 }
 0x381   :  { %2159 = vmatmul.mubr.bf16.vlgmr.msra.gmra.mrb[64].mxu0 %v3149_v53 }
 0x454   :  { %v1879_v9 = vpop.f32.mrb[64].mxu0 }
 0x455   :  { %v1880_v4 = vadd.f32 %v1879_v9, %v1844_v61  ;;  %v1881_v21 = vpop.f32.mrb[65].mxu0 }
 0x456   :  { %v1882_v6 = vadd.f32 %v1881_v21, %v1844_v61  ;;  %v1883_v35 = vpop.f32.mrb[66].mxu0 }
 0x457   :  { %v1884_v57 = vpop.f32.mrb[67].mxu0 }
 0x458   :  { %v1888_v40 = vcombine.low %v1880_v4, %v1882_v6 }
 0x45a   :  { %v1895_v56 = vrot.slane %v1888_v40, %v1894_v22 }
 0x45c   :  { %v1902_v53 = vrot.slane %v1895_v56, %v1894_v22 }
 0x45e   :  { %1908 = vst.msk [vmem:[#allocation3] sm:$0x3] %vm1906_vm3, %v1902_v53 }
 0x45f   :  { %2480 = shalt.err (!%p2477_p4)
}
 0x460   :  { %s2481_s22 = scalar_lea.hbm %s3241_s15, 32 }
 0x461   :  { %p2482_p5 = scmp.ne.s32.totalorder %s3241_s15, %s2481_s22  ;;  %p2485_p6 = scmp.lt.u32.totalorder %s2481_s22, %s3241_s15 }
 0x463   :  { %p2487_p7 = pnand %p2485_p6, %p2482_p5 }
 0x465   :  { %2490 = shalt.err (!%p2487_p7)
}
 0x466   :  { %1918 = dma.vmem_to_hbm [thread:$0]  %s1916_s13, 32, %s3241_s15, [#allocation4]  }
 0x467   :  { %2491 = dma.done.wait [#allocation4], 32  }
 0x468   :  { %2492 = vsyncadd [#allocation4], 4294967264 }
 0x469   :  { %1922 = vsyncpa [#allocation4], 1 }

</bundles_post_ra>
